<compile_context>
chip_gen: v5e
topology: v5e:2x2
jax: 0.10.0
libtpu: 0.0.40
codegen_flags: <defaults>
</compile_context>

<pallas_src>
import functools

import jax
import jax.numpy as jnp
from jax.experimental import pallas as pl
from jax.experimental.pallas import tpu as pltpu

LANE_PAD = 32  # zero lanes on each side of the flattened image (must be >= W + 1)


def basic_block_kernel(x_ref, w1_ref, b1_ref, w2_ref, b2_ref, mask_ref,
                       out_ref, mid_ref, p1_ref, p2_ref,
                       *, H, W, Cin, Cmid, Cout, B_TILE):
    """Processes B_TILE batch images per grid step.

    x_ref   : (B_TILE, Cin, PAD + H*W + PAD)  lane-padded flattened NCHW input (bf16)
    w1_ref  : (Cmid, 9*Cin)                   conv1 weights, BN1 scale folded (bf16)
    b1_ref  : (Cmid, 1)                       BN1 bias (f32)
    w2_ref  : (Cout, 9*Cmid)                  conv2 weights, BN2 scale folded (bf16)
    b2_ref  : (Cout, 1)                       BN2 bias (f32)
    mask_ref: (2, H*W)                        left/right column-border masks (bf16)
    out_ref : (B_TILE, Cout, H*W)             lane-dense NCHW output block (f32)
    mid_ref : (B_TILE, Cmid, PAD + H*W + PAD) lane-padded intermediate scratch (bf16)
    p1_ref  : (9*Cin,  B_TILE*H*W)            im2col scratch for conv1 (bf16)
    p2_ref  : (9*Cmid, B_TILE*H*W)            im2col scratch for conv2 (bf16)
    """
    HW = H * W
    PAD = LANE_PAD
    # (flattened lane offset, sx) of tap (ky, kx) relative to the output pixel.
    taps = [((ky - 1) * W + (kx - 1), kx - 1)
            for ky in range(3) for kx in range(3)]

    def masked(win, sx):
        # Column-border mask only; row borders are already covered by the
        # +-PAD zero lane pad (requires PAD >= W + 1).  sx == 0 taps (3 of 9)
        # need no multiply at all.
        if sx == -1:
            return win * mask_ref[0:1, :]
        if sx == 1:
            return win * mask_ref[1:2, :]
        return win

    # ---- conv1: im2col straight from the lane-padded bf16 input ----
    for k, (off, sx) in enumerate(taps):
        for bi in range(B_TILE):
            win = x_ref[bi, :, PAD + off:PAD + off + HW]          # (Cin, HW) bf16
            p1_ref[k * Cin:(k + 1) * Cin, bi * HW:(bi + 1) * HW] = masked(win, sx)
    a1 = jnp.dot(w1_ref[...], p1_ref[...],
                 preferred_element_type=jnp.float32)              # (Cmid, B_TILE*HW) f32

    # ---- bn1 (scale folded into w1, bias here) + relu ----
    out1 = jnp.maximum(a1 + b1_ref[...], 0.0).astype(jnp.bfloat16)

    # ---- stash out1 lane-padded so conv2 taps are plain lane slices ----
    # Zero only the tiny pad strips; done every step so it is megacore-safe
    # (each core's scratch is uninitialized and may start at program_id != 0).
    zpad = jnp.zeros((B_TILE, Cmid, PAD), jnp.bfloat16)
    mid_ref[:, :, :PAD] = zpad
    mid_ref[:, :, PAD + HW:] = zpad
    for bi in range(B_TILE):
        mid_ref[bi, :, PAD:PAD + HW] = out1[:, bi * HW:(bi + 1) * HW]

    # ---- conv2 ----
    for k, (off, sx) in enumerate(taps):
        for bi in range(B_TILE):
            win = mid_ref[bi, :, PAD + off:PAD + off + HW]        # (Cmid, HW) bf16
            p2_ref[k * Cmid:(k + 1) * Cmid, bi * HW:(bi + 1) * HW] = masked(win, sx)
    a2 = jnp.dot(w2_ref[...], p2_ref[...],
                 preferred_element_type=jnp.float32)              # (Cout, B_TILE*HW) f32

    # ---- bn2 + residual add + relu (f32 arithmetic, residual from bf16 x) ----
    for bi in range(B_TILE):
        residual = x_ref[bi, :, PAD:PAD + HW].astype(jnp.float32)  # (Cin == Cout, HW)
        out_ref[bi] = jnp.maximum(
            a2[:, bi * HW:(bi + 1) * HW] + b2_ref[...] + residual, 0.0)


def basic_block_forward(x_nchw, w1, g1, be1, rm1, rv1, w2, g2, be2, rm2, rv2,
                        eps=1e-5, b_tile=2):
    """x_nchw: (B, Cin, H, W); w1: (Cmid, Cin, 3, 3); w2: (Cout, Cmid, 3, 3)."""
    B, Cin, H, W = x_nchw.shape
    Cmid = w1.shape[0]
    Cout = w2.shape[0]
    HW = H * W
    PAD = LANE_PAD
    assert Cout == Cin, "stride=1 / no downsample requires planes == inplanes"
    assert PAD >= W + 1  # load-bearing for the unaligned lane-slice taps
    B_TILE = b_tile if (b_tile >= 1 and B % b_tile == 0) else 1

    # Fold BatchNorm (eval mode): scale into the conv weights, keep the bias.
    s1 = g1 / jnp.sqrt(rv1 + eps)
    s2 = g2 / jnp.sqrt(rv2 + eps)
    b1 = (be1 - rm1 * s1).reshape(Cmid, 1).astype(jnp.float32)
    b2 = (be2 - rm2 * s2).reshape(Cout, 1).astype(jnp.float32)

    # OIHW -> (O, 9*I) dense slabs, column index = (ky*3+kx)*I + i, bf16.
    w1_2d = jnp.transpose(w1 * s1[:, None, None, None],
                          (0, 2, 3, 1)).reshape(Cmid, 9 * Cin).astype(jnp.bfloat16)
    w2_2d = jnp.transpose(w2 * s2[:, None, None, None],
                          (0, 2, 3, 1)).reshape(Cout, 9 * Cmid).astype(jnp.bfloat16)

    # Column-border masks only (row borders are handled by the zero lane pad).
    ww = jnp.arange(W)
    left = jnp.tile((ww >= 1).astype(jnp.bfloat16), H)        # tap sx = -1
    right = jnp.tile((ww <= W - 2).astype(jnp.bfloat16), H)   # tap sx = +1
    mask = jnp.stack([left, right], axis=0)                    # (2, HW) bf16

    # NCHW stays NCHW: flatten spatial dims (free reshape), cast to bf16
    # (halves the streamed-input DMA), add small zero lane pads so every conv
    # tap is a contiguous lane window.
    x_flat = x_nchw.reshape(B, Cin, HW).astype(jnp.bfloat16)
    x_pad = jnp.pad(x_flat, ((0, 0), (0, 0), (PAD, PAD)))
    Wlane = HW + 2 * PAD

    kernel = functools.partial(basic_block_kernel, H=H, W=W, Cin=Cin,
                               Cmid=Cmid, Cout=Cout, B_TILE=B_TILE)

    out_flat = pl.pallas_call(
        kernel,
        out_shape=jax.ShapeDtypeStruct((B, Cout, HW), jnp.float32),
        grid_spec=pltpu.PrefetchScalarGridSpec(
            num_scalar_prefetch=0,
            grid=(B // B_TILE,),
            in_specs=[
                pl.BlockSpec((B_TILE, Cin, Wlane), lambda b: (b, 0, 0)),
                pl.BlockSpec((Cmid, 9 * Cin), lambda b: (0, 0)),
                pl.BlockSpec((Cmid, 1), lambda b: (0, 0)),
                pl.BlockSpec((Cout, 9 * Cmid), lambda b: (0, 0)),
                pl.BlockSpec((Cout, 1), lambda b: (0, 0)),
                pl.BlockSpec((2, HW), lambda b: (0, 0)),
            ],
            out_specs=pl.BlockSpec((B_TILE, Cout, HW), lambda b: (b, 0, 0)),
            scratch_shapes=[
                pltpu.VMEM((B_TILE, Cmid, Wlane), jnp.bfloat16),   # padded mid
                pltpu.VMEM((9 * Cin, B_TILE * HW), jnp.bfloat16),  # im2col conv1
                pltpu.VMEM((9 * Cmid, B_TILE * HW), jnp.bfloat16),  # im2col conv2
            ],
        ),
        compiler_params=pltpu.CompilerParams(
            dimension_semantics=("parallel",)),
    )(x_pad, w1_2d, b1, w2_2d, b2, mask)

    # (B, Cout, H*W) -> (B, Cout, H, W): contiguous reshape, no transpose.
    return out_flat.reshape(B, Cout, H, W)


def basic_block_reference(x, w1, g1, be1, rm1, rv1, w2, g2, be2, rm2, rv2,
                          eps=1e-5):
    """Pure-JAX f32 reference (NCHW, same semantics) for the correctness check."""
    def conv3x3(x, w):
        return jax.lax.conv_general_dilated(
            x, w, window_strides=(1, 1), padding=((1, 1), (1, 1)),
            dimension_numbers=("NCHW", "OIHW", "NCHW"))

    def bn(x, g, b, rm, rv):
        g = g.reshape(1, -1, 1, 1)
        b = b.reshape(1, -1, 1, 1)
        rm = rm.reshape(1, -1, 1, 1)
        rv = rv.reshape(1, -1, 1, 1)
        return (x - rm) / jnp.sqrt(rv + eps) * g + b

    out = jax.nn.relu(bn(conv3x3(x, w1), g1, be1, rm1, rv1))
    out = bn(conv3x3(out, w2), g2, be2, rm2, rv2)
    return jax.nn.relu(out + x)


if __name__ == "__main__":
    # Shapes: inplanes = planes = 4 (residual add requires equality),
    # hidden width cfg = 8, batch = 2, spatial = 16.
    B, Cin, H, W = 2, 4, 16, 16
    Cfg = 8
    Cout = Cin

    key = jax.random.PRNGKey(0)
    ks = jax.random.split(key, 11)

    x = jax.random.normal(ks[0], (B, Cin, H, W), jnp.float32)

    w1 = jax.random.normal(ks[1], (Cfg, Cin, 3, 3), jnp.float32) * 0.2
    g1 = 1.0 + 0.1 * jax.random.normal(ks[2], (Cfg,), jnp.float32)
    be1 = 0.1 * jax.random.normal(ks[3], (Cfg,), jnp.float32)
    rm1 = 0.1 * jax.random.normal(ks[4], (Cfg,), jnp.float32)
    rv1 = 1.0 + 0.1 * jax.random.uniform(ks[5], (Cfg,), jnp.float32)

    w2 = jax.random.normal(ks[6], (Cout, Cfg, 3, 3), jnp.float32) * 0.2
    g2 = 1.0 + 0.1 * jax.random.normal(ks[7], (Cout,), jnp.float32)
    be2 = 0.1 * jax.random.normal(ks[8], (Cout,), jnp.float32)
    rm2 = 0.1 * jax.random.normal(ks[9], (Cout,), jnp.float32)
    rv2 = 1.0 + 0.1 * jax.random.uniform(ks[10], (Cout,), jnp.float32)

    out = basic_block_forward(x, w1, g1, be1, rm1, rv1, w2, g2, be2, rm2, rv2)
    out = jax.block_until_ready(out)

    ref = basic_block_reference(x, w1, g1, be1, rm1, rv1, w2, g2, be2, rm2, rv2)
    ref = jax.block_until_ready(ref)

    assert out.shape == (B, Cout, H, W)
    # bf16 MXU operands / bf16 streamed input with f32 accumulation ->
    # loosened tolerance.
    max_err = jnp.max(jnp.abs(out - ref))
    assert jnp.allclose(out, ref, atol=5e-2, rtol=5e-2), (
        f"max abs err = {max_err}")

    print("KERNEL_OK")
</pallas_src>

<mosaic_0001>
module attributes {stable_mosaic.version = 11 : i64} {
  func.func @basic_block_kernel(%arg0: i32, %arg1: memref<2x4x320xbf16, #tpu.memory_space<vmem>>, %arg2: memref<8x36xbf16, #tpu.memory_space<vmem>>, %arg3: memref<8x1xf32, #tpu.memory_space<vmem>>, %arg4: memref<4x72xbf16, #tpu.memory_space<vmem>>, %arg5: memref<4x1xf32, #tpu.memory_space<vmem>>, %arg6: memref<2x256xbf16, #tpu.memory_space<vmem>>, %arg7: memref<2x4x256xf32, #tpu.memory_space<vmem>>, %arg8: memref<2x8x320xbf16, #tpu.memory_space<vmem>>, %arg9: memref<36x512xbf16, #tpu.memory_space<vmem>>, %arg10: memref<72x512xbf16, #tpu.memory_space<vmem>>) attributes {dimension_semantics = [#tpu.dimension_semantics<parallel>], iteration_bounds = array<i64: 1>, scalar_prefetch = 0 : i64, scratch_operands = 3 : i64, tpu.core_type = #tpu.core_type<tc>, window_params = [{transform_indices = @transform_0, window_bounds = array<i64: 2, 4, 320>}, {pipeline_mode = #tpu.pipeline_mode<synchronous>, transform_indices = @transform_1, window_bounds = array<i64: 8, 36>}, {pipeline_mode = #tpu.pipeline_mode<synchronous>, transform_indices = @transform_2, window_bounds = array<i64: 8, 1>}, {pipeline_mode = #tpu.pipeline_mode<synchronous>, transform_indices = @transform_3, window_bounds = array<i64: 4, 72>}, {pipeline_mode = #tpu.pipeline_mode<synchronous>, transform_indices = @transform_4, window_bounds = array<i64: 4, 1>}, {pipeline_mode = #tpu.pipeline_mode<synchronous>, transform_indices = @transform_5, window_bounds = array<i64: 2, 256>}, {transform_indices = @transform_6, window_bounds = array<i64: 2, 4, 256>}]} {
    %c0 = arith.constant 0 : index
    %c0_0 = arith.constant 0 : index
    %c15 = arith.constant 15 : index
    %0 = vector.load %arg1[%c0, %c0_0, %c15] : memref<2x4x320xbf16, #tpu.memory_space<vmem>>, vector<1x4x256xbf16>
    %1 = vector.shape_cast %0 : vector<1x4x256xbf16> to vector<4x256xbf16>
    %c0_1 = arith.constant 0 : index
    %c0_2 = arith.constant 0 : index
    %2 = vector.load %arg6[%c0_1, %c0_2] : memref<2x256xbf16, #tpu.memory_space<vmem>>, vector<1x256xbf16>
    %3 = vector.broadcast %2 : vector<1x256xbf16> to vector<4x256xbf16>
    %4 = arith.mulf %1, %3 : vector<4x256xbf16>
    %c0_3 = arith.constant 0 : index
    %c0_4 = arith.constant 0 : index
    %5 = vector.load %arg9[%c0_3, %c0_4] : memref<36x512xbf16, #tpu.memory_space<vmem>>, vector<4x256xbf16>
    tpu.vector_store %arg9[%c0_3, %c0_4], %4 {strides = array<i32>} : memref<36x512xbf16, #tpu.memory_space<vmem>>, vector<4x256xbf16>,
    %c1 = arith.constant 1 : index
    %c0_5 = arith.constant 0 : index
    %c15_6 = arith.constant 15 : index
    %6 = vector.load %arg1[%c1, %c0_5, %c15_6] : memref<2x4x320xbf16, #tpu.memory_space<vmem>>, vector<1x4x256xbf16>
    %7 = vector.shape_cast %6 : vector<1x4x256xbf16> to vector<4x256xbf16>
    %c0_7 = arith.constant 0 : index
    %c0_8 = arith.constant 0 : index
    %8 = vector.load %arg6[%c0_7, %c0_8] : memref<2x256xbf16, #tpu.memory_space<vmem>>, vector<1x256xbf16>
    %9 = vector.broadcast %8 : vector<1x256xbf16> to vector<4x256xbf16>
    %10 = arith.mulf %7, %9 : vector<4x256xbf16>
    %c0_9 = arith.constant 0 : index
    %c256 = arith.constant 256 : index
    %11 = vector.load %arg9[%c0_9, %c256] : memref<36x512xbf16, #tpu.memory_space<vmem>>, vector<4x256xbf16>
    tpu.vector_store %arg9[%c0_9, %c256], %10 {strides = array<i32>} : memref<36x512xbf16, #tpu.memory_space<vmem>>, vector<4x256xbf16>,
    %c0_10 = arith.constant 0 : index
    %c0_11 = arith.constant 0 : index
    %c16 = arith.constant 16 : index
    %12 = vector.load %arg1[%c0_10, %c0_11, %c16] : memref<2x4x320xbf16, #tpu.memory_space<vmem>>, vector<1x4x256xbf16>
    %13 = vector.shape_cast %12 : vector<1x4x256xbf16> to vector<4x256xbf16>
    %c4 = arith.constant 4 : index
    %c0_12 = arith.constant 0 : index
    %14 = vector.load %arg9[%c4, %c0_12] : memref<36x512xbf16, #tpu.memory_space<vmem>>, vector<4x256xbf16>
    tpu.vector_store %arg9[%c4, %c0_12], %13 {strides = array<i32>} : memref<36x512xbf16, #tpu.memory_space<vmem>>, vector<4x256xbf16>,
    %c1_13 = arith.constant 1 : index
    %c0_14 = arith.constant 0 : index
    %c16_15 = arith.constant 16 : index
    %15 = vector.load %arg1[%c1_13, %c0_14, %c16_15] : memref<2x4x320xbf16, #tpu.memory_space<vmem>>, vector<1x4x256xbf16>
    %16 = vector.shape_cast %15 : vector<1x4x256xbf16> to vector<4x256xbf16>
    %c4_16 = arith.constant 4 : index
    %c256_17 = arith.constant 256 : index
    %17 = vector.load %arg9[%c4_16, %c256_17] : memref<36x512xbf16, #tpu.memory_space<vmem>>, vector<4x256xbf16>
    tpu.vector_store %arg9[%c4_16, %c256_17], %16 {strides = array<i32>} : memref<36x512xbf16, #tpu.memory_space<vmem>>, vector<4x256xbf16>,
    %c0_18 = arith.constant 0 : index
    %c0_19 = arith.constant 0 : index
    %c17 = arith.constant 17 : index
    %18 = vector.load %arg1[%c0_18, %c0_19, %c17] : memref<2x4x320xbf16, #tpu.memory_space<vmem>>, vector<1x4x256xbf16>
    %19 = vector.shape_cast %18 : vector<1x4x256xbf16> to vector<4x256xbf16>
    %c1_20 = arith.constant 1 : index
    %c0_21 = arith.constant 0 : index
    %20 = vector.load %arg6[%c1_20, %c0_21] : memref<2x256xbf16, #tpu.memory_space<vmem>>, vector<1x256xbf16>
    %21 = vector.broadcast %20 : vector<1x256xbf16> to vector<4x256xbf16>
    %22 = arith.mulf %19, %21 : vector<4x256xbf16>
    %c8 = arith.constant 8 : index
    %c0_22 = arith.constant 0 : index
    %23 = vector.load %arg9[%c8, %c0_22] : memref<36x512xbf16, #tpu.memory_space<vmem>>, vector<4x256xbf16>
    tpu.vector_store %arg9[%c8, %c0_22], %22 {strides = array<i32>} : memref<36x512xbf16, #tpu.memory_space<vmem>>, vector<4x256xbf16>,
    %c1_23 = arith.constant 1 : index
    %c0_24 = arith.constant 0 : index
    %c17_25 = arith.constant 17 : index
    %24 = vector.load %arg1[%c1_23, %c0_24, %c17_25] : memref<2x4x320xbf16, #tpu.memory_space<vmem>>, vector<1x4x256xbf16>
    %25 = vector.shape_cast %24 : vector<1x4x256xbf16> to vector<4x256xbf16>
    %c1_26 = arith.constant 1 : index
    %c0_27 = arith.constant 0 : index
    %26 = vector.load %arg6[%c1_26, %c0_27] : memref<2x256xbf16, #tpu.memory_space<vmem>>, vector<1x256xbf16>
    %27 = vector.broadcast %26 : vector<1x256xbf16> to vector<4x256xbf16>
    %28 = arith.mulf %25, %27 : vector<4x256xbf16>
    %c8_28 = arith.constant 8 : index
    %c256_29 = arith.constant 256 : index
    %29 = vector.load %arg9[%c8_28, %c256_29] : memref<36x512xbf16, #tpu.memory_space<vmem>>, vector<4x256xbf16>
    tpu.vector_store %arg9[%c8_28, %c256_29], %28 {strides = array<i32>} : memref<36x512xbf16, #tpu.memory_space<vmem>>, vector<4x256xbf16>,
    %c0_30 = arith.constant 0 : index
    %c0_31 = arith.constant 0 : index
    %c31 = arith.constant 31 : index
    %30 = vector.load %arg1[%c0_30, %c0_31, %c31] : memref<2x4x320xbf16, #tpu.memory_space<vmem>>, vector<1x4x256xbf16>
    %31 = vector.shape_cast %30 : vector<1x4x256xbf16> to vector<4x256xbf16>
    %c0_32 = arith.constant 0 : index
    %c0_33 = arith.constant 0 : index
    %32 = vector.load %arg6[%c0_32, %c0_33] : memref<2x256xbf16, #tpu.memory_space<vmem>>, vector<1x256xbf16>
    %33 = vector.broadcast %32 : vector<1x256xbf16> to vector<4x256xbf16>
    %34 = arith.mulf %31, %33 : vector<4x256xbf16>
    %c12 = arith.constant 12 : index
    %c0_34 = arith.constant 0 : index
    %35 = vector.load %arg9[%c12, %c0_34] : memref<36x512xbf16, #tpu.memory_space<vmem>>, vector<4x256xbf16>
    tpu.vector_store %arg9[%c12, %c0_34], %34 {strides = array<i32>} : memref<36x512xbf16, #tpu.memory_space<vmem>>, vector<4x256xbf16>,
    %c1_35 = arith.constant 1 : index
    %c0_36 = arith.constant 0 : index
    %c31_37 = arith.constant 31 : index
    %36 = vector.load %arg1[%c1_35, %c0_36, %c31_37] : memref<2x4x320xbf16, #tpu.memory_space<vmem>>, vector<1x4x256xbf16>
    %37 = vector.shape_cast %36 : vector<1x4x256xbf16> to vector<4x256xbf16>
    %c0_38 = arith.constant 0 : index
    %c0_39 = arith.constant 0 : index
    %38 = vector.load %arg6[%c0_38, %c0_39] : memref<2x256xbf16, #tpu.memory_space<vmem>>, vector<1x256xbf16>
    %39 = vector.broadcast %38 : vector<1x256xbf16> to vector<4x256xbf16>
    %40 = arith.mulf %37, %39 : vector<4x256xbf16>
    %c12_40 = arith.constant 12 : index
    %c256_41 = arith.constant 256 : index
    %41 = vector.load %arg9[%c12_40, %c256_41] : memref<36x512xbf16, #tpu.memory_space<vmem>>, vector<4x256xbf16>
    tpu.vector_store %arg9[%c12_40, %c256_41], %40 {strides = array<i32>} : memref<36x512xbf16, #tpu.memory_space<vmem>>, vector<4x256xbf16>,
    %c0_42 = arith.constant 0 : index
    %c0_43 = arith.constant 0 : index
    %c32 = arith.constant 32 : index
    %42 = vector.load %arg1[%c0_42, %c0_43, %c32] : memref<2x4x320xbf16, #tpu.memory_space<vmem>>, vector<1x4x256xbf16>
    %43 = vector.shape_cast %42 : vector<1x4x256xbf16> to vector<4x256xbf16>
    %c16_44 = arith.constant 16 : index
    %c0_45 = arith.constant 0 : index
    %44 = vector.load %arg9[%c16_44, %c0_45] : memref<36x512xbf16, #tpu.memory_space<vmem>>, vector<4x256xbf16>
    tpu.vector_store %arg9[%c16_44, %c0_45], %43 {strides = array<i32>} : memref<36x512xbf16, #tpu.memory_space<vmem>>, vector<4x256xbf16>,
    %c1_46 = arith.constant 1 : index
    %c0_47 = arith.constant 0 : index
    %c32_48 = arith.constant 32 : index
    %45 = vector.load %arg1[%c1_46, %c0_47, %c32_48] : memref<2x4x320xbf16, #tpu.memory_space<vmem>>, vector<1x4x256xbf16>
    %46 = vector.shape_cast %45 : vector<1x4x256xbf16> to vector<4x256xbf16>
    %c16_49 = arith.constant 16 : index
    %c256_50 = arith.constant 256 : index
    %47 = vector.load %arg9[%c16_49, %c256_50] : memref<36x512xbf16, #tpu.memory_space<vmem>>, vector<4x256xbf16>
    tpu.vector_store %arg9[%c16_49, %c256_50], %46 {strides = array<i32>} : memref<36x512xbf16, #tpu.memory_space<vmem>>, vector<4x256xbf16>,
    %c0_51 = arith.constant 0 : index
    %c0_52 = arith.constant 0 : index
    %c33 = arith.constant 33 : index
    %48 = vector.load %arg1[%c0_51, %c0_52, %c33] : memref<2x4x320xbf16, #tpu.memory_space<vmem>>, vector<1x4x256xbf16>
    %49 = vector.shape_cast %48 : vector<1x4x256xbf16> to vector<4x256xbf16>
    %c1_53 = arith.constant 1 : index
    %c0_54 = arith.constant 0 : index
    %50 = vector.load %arg6[%c1_53, %c0_54] : memref<2x256xbf16, #tpu.memory_space<vmem>>, vector<1x256xbf16>
    %51 = vector.broadcast %50 : vector<1x256xbf16> to vector<4x256xbf16>
    %52 = arith.mulf %49, %51 : vector<4x256xbf16>
    %c20 = arith.constant 20 : index
    %c0_55 = arith.constant 0 : index
    %53 = vector.load %arg9[%c20, %c0_55] : memref<36x512xbf16, #tpu.memory_space<vmem>>, vector<4x256xbf16>
    tpu.vector_store %arg9[%c20, %c0_55], %52 {strides = array<i32>} : memref<36x512xbf16, #tpu.memory_space<vmem>>, vector<4x256xbf16>,
    %c1_56 = arith.constant 1 : index
    %c0_57 = arith.constant 0 : index
    %c33_58 = arith.constant 33 : index
    %54 = vector.load %arg1[%c1_56, %c0_57, %c33_58] : memref<2x4x320xbf16, #tpu.memory_space<vmem>>, vector<1x4x256xbf16>
    %55 = vector.shape_cast %54 : vector<1x4x256xbf16> to vector<4x256xbf16>
    %c1_59 = arith.constant 1 : index
    %c0_60 = arith.constant 0 : index
    %56 = vector.load %arg6[%c1_59, %c0_60] : memref<2x256xbf16, #tpu.memory_space<vmem>>, vector<1x256xbf16>
    %57 = vector.broadcast %56 : vector<1x256xbf16> to vector<4x256xbf16>
    %58 = arith.mulf %55, %57 : vector<4x256xbf16>
    %c20_61 = arith.constant 20 : index
    %c256_62 = arith.constant 256 : index
    %59 = vector.load %arg9[%c20_61, %c256_62] : memref<36x512xbf16, #tpu.memory_space<vmem>>, vector<4x256xbf16>
    tpu.vector_store %arg9[%c20_61, %c256_62], %58 {strides = array<i32>} : memref<36x512xbf16, #tpu.memory_space<vmem>>, vector<4x256xbf16>,
    %c0_63 = arith.constant 0 : index
    %c0_64 = arith.constant 0 : index
    %c47 = arith.constant 47 : index
    %60 = vector.load %arg1[%c0_63, %c0_64, %c47] : memref<2x4x320xbf16, #tpu.memory_space<vmem>>, vector<1x4x256xbf16>
    %61 = vector.shape_cast %60 : vector<1x4x256xbf16> to vector<4x256xbf16>
    %c0_65 = arith.constant 0 : index
    %c0_66 = arith.constant 0 : index
    %62 = vector.load %arg6[%c0_65, %c0_66] : memref<2x256xbf16, #tpu.memory_space<vmem>>, vector<1x256xbf16>
    %63 = vector.broadcast %62 : vector<1x256xbf16> to vector<4x256xbf16>
    %64 = arith.mulf %61, %63 : vector<4x256xbf16>
    %c24 = arith.constant 24 : index
    %c0_67 = arith.constant 0 : index
    %65 = vector.load %arg9[%c24, %c0_67] : memref<36x512xbf16, #tpu.memory_space<vmem>>, vector<4x256xbf16>
    tpu.vector_store %arg9[%c24, %c0_67], %64 {strides = array<i32>} : memref<36x512xbf16, #tpu.memory_space<vmem>>, vector<4x256xbf16>,
    %c1_68 = arith.constant 1 : index
    %c0_69 = arith.constant 0 : index
    %c47_70 = arith.constant 47 : index
    %66 = vector.load %arg1[%c1_68, %c0_69, %c47_70] : memref<2x4x320xbf16, #tpu.memory_space<vmem>>, vector<1x4x256xbf16>
    %67 = vector.shape_cast %66 : vector<1x4x256xbf16> to vector<4x256xbf16>
    %c0_71 = arith.constant 0 : index
    %c0_72 = arith.constant 0 : index
    %68 = vector.load %arg6[%c0_71, %c0_72] : memref<2x256xbf16, #tpu.memory_space<vmem>>, vector<1x256xbf16>
    %69 = vector.broadcast %68 : vector<1x256xbf16> to vector<4x256xbf16>
    %70 = arith.mulf %67, %69 : vector<4x256xbf16>
    %c24_73 = arith.constant 24 : index
    %c256_74 = arith.constant 256 : index
    %71 = vector.load %arg9[%c24_73, %c256_74] : memref<36x512xbf16, #tpu.memory_space<vmem>>, vector<4x256xbf16>
    tpu.vector_store %arg9[%c24_73, %c256_74], %70 {strides = array<i32>} : memref<36x512xbf16, #tpu.memory_space<vmem>>, vector<4x256xbf16>,
    %c0_75 = arith.constant 0 : index
    %c0_76 = arith.constant 0 : index
    %c48 = arith.constant 48 : index
    %72 = vector.load %arg1[%c0_75, %c0_76, %c48] : memref<2x4x320xbf16, #tpu.memory_space<vmem>>, vector<1x4x256xbf16>
    %73 = vector.shape_cast %72 : vector<1x4x256xbf16> to vector<4x256xbf16>
    %c28 = arith.constant 28 : index
    %c0_77 = arith.constant 0 : index
    %74 = vector.load %arg9[%c28, %c0_77] : memref<36x512xbf16, #tpu.memory_space<vmem>>, vector<4x256xbf16>
    tpu.vector_store %arg9[%c28, %c0_77], %73 {strides = array<i32>} : memref<36x512xbf16, #tpu.memory_space<vmem>>, vector<4x256xbf16>,
    %c1_78 = arith.constant 1 : index
    %c0_79 = arith.constant 0 : index
    %c48_80 = arith.constant 48 : index
    %75 = vector.load %arg1[%c1_78, %c0_79, %c48_80] : memref<2x4x320xbf16, #tpu.memory_space<vmem>>, vector<1x4x256xbf16>
    %76 = vector.shape_cast %75 : vector<1x4x256xbf16> to vector<4x256xbf16>
    %c28_81 = arith.constant 28 : index
    %c256_82 = arith.constant 256 : index
    %77 = vector.load %arg9[%c28_81, %c256_82] : memref<36x512xbf16, #tpu.memory_space<vmem>>, vector<4x256xbf16>
    tpu.vector_store %arg9[%c28_81, %c256_82], %76 {strides = array<i32>} : memref<36x512xbf16, #tpu.memory_space<vmem>>, vector<4x256xbf16>,
    %c0_83 = arith.constant 0 : index
    %c0_84 = arith.constant 0 : index
    %c49 = arith.constant 49 : index
    %78 = vector.load %arg1[%c0_83, %c0_84, %c49] : memref<2x4x320xbf16, #tpu.memory_space<vmem>>, vector<1x4x256xbf16>
    %79 = vector.shape_cast %78 : vector<1x4x256xbf16> to vector<4x256xbf16>
    %c1_85 = arith.constant 1 : index
    %c0_86 = arith.constant 0 : index
    %80 = vector.load %arg6[%c1_85, %c0_86] : memref<2x256xbf16, #tpu.memory_space<vmem>>, vector<1x256xbf16>
    %81 = vector.broadcast %80 : vector<1x256xbf16> to vector<4x256xbf16>
    %82 = arith.mulf %79, %81 : vector<4x256xbf16>
    %c32_87 = arith.constant 32 : index
    %c0_88 = arith.constant 0 : index
    %83 = vector.load %arg9[%c32_87, %c0_88] : memref<36x512xbf16, #tpu.memory_space<vmem>>, vector<4x256xbf16>
    tpu.vector_store %arg9[%c32_87, %c0_88], %82 {strides = array<i32>} : memref<36x512xbf16, #tpu.memory_space<vmem>>, vector<4x256xbf16>,
    %c1_89 = arith.constant 1 : index
    %c0_90 = arith.constant 0 : index
    %c49_91 = arith.constant 49 : index
    %84 = vector.load %arg1[%c1_89, %c0_90, %c49_91] : memref<2x4x320xbf16, #tpu.memory_space<vmem>>, vector<1x4x256xbf16>
    %85 = vector.shape_cast %84 : vector<1x4x256xbf16> to vector<4x256xbf16>
    %c1_92 = arith.constant 1 : index
    %c0_93 = arith.constant 0 : index
    %86 = vector.load %arg6[%c1_92, %c0_93] : memref<2x256xbf16, #tpu.memory_space<vmem>>, vector<1x256xbf16>
    %87 = vector.broadcast %86 : vector<1x256xbf16> to vector<4x256xbf16>
    %88 = arith.mulf %85, %87 : vector<4x256xbf16>
    %c32_94 = arith.constant 32 : index
    %c256_95 = arith.constant 256 : index
    %89 = vector.load %arg9[%c32_94, %c256_95] : memref<36x512xbf16, #tpu.memory_space<vmem>>, vector<4x256xbf16>
    tpu.vector_store %arg9[%c32_94, %c256_95], %88 {strides = array<i32>} : memref<36x512xbf16, #tpu.memory_space<vmem>>, vector<4x256xbf16>,
    %c0_96 = arith.constant 0 : index
    %c0_97 = arith.constant 0 : index
    %90 = vector.load %arg2[%c0_96, %c0_97] : memref<8x36xbf16, #tpu.memory_space<vmem>>, vector<8x36xbf16>
    %c0_98 = arith.constant 0 : index
    %c0_99 = arith.constant 0 : index
    %91 = vector.load %arg9[%c0_98, %c0_99] : memref<36x512xbf16, #tpu.memory_space<vmem>>, vector<36x512xbf16>
    %cst = arith.constant dense<0.000000e+00> : vector<8x512xf32>
    %92 = tpu.matmul %90, %91, %cst {dimension_numbers = #tpu.dot_dimension_numbers<[1], [0], [0], [1], [0, 0, 1, 1], [], []>} : vector<8x36xbf16>, vector<36x512xbf16>, vector<8x512xf32> -> vector<8x512xf32>
    %c0_100 = arith.constant 0 : index
    %c0_101 = arith.constant 0 : index
    %93 = vector.load %arg3[%c0_100, %c0_101] : memref<8x1xf32, #tpu.memory_space<vmem>>, vector<8x1xf32>
    %94 = vector.broadcast %93 : vector<8x1xf32> to vector<8x512xf32>
    %95 = arith.addf %92, %94 : vector<8x512xf32>
    %cst_102 = arith.constant 0.000000e+00 : f32
    %96 = vector.broadcast %cst_102 : f32 to vector<8x512xf32>
    %97 = arith.maximumf %95, %96 : vector<8x512xf32>
    %98 = arith.truncf %97 : vector<8x512xf32> to vector<8x512xbf16>
    %cst_103 = arith.constant 0.000000e+00 : bf16
    %99 = vector.broadcast %cst_103 : bf16 to vector<2x8x32xbf16>
    %c0_104 = arith.constant 0 : index
    %c0_105 = arith.constant 0 : index
    %c0_106 = arith.constant 0 : index
    %100 = vector.load %arg8[%c0_104, %c0_105, %c0_106] : memref<2x8x320xbf16, #tpu.memory_space<vmem>>, vector<2x8x32xbf16>
    tpu.vector_store %arg8[%c0_104, %c0_105, %c0_106], %99 {strides = array<i32>} : memref<2x8x320xbf16, #tpu.memory_space<vmem>>, vector<2x8x32xbf16>,
    %c0_107 = arith.constant 0 : index
    %c0_108 = arith.constant 0 : index
    %c288 = arith.constant 288 : index
    %101 = vector.load %arg8[%c0_107, %c0_108, %c288] : memref<2x8x320xbf16, #tpu.memory_space<vmem>>, vector<2x8x32xbf16>
    tpu.vector_store %arg8[%c0_107, %c0_108, %c288], %99 {strides = array<i32>} : memref<2x8x320xbf16, #tpu.memory_space<vmem>>, vector<2x8x32xbf16>,
    %102 = vector.extract_strided_slice %98 {offsets = [0, 0], sizes = [8, 256], strides = [1, 1]} : vector<8x512xbf16> to vector<8x256xbf16>
    %c0_109 = arith.constant 0 : index
    %c0_110 = arith.constant 0 : index
    %c32_111 = arith.constant 32 : index
    %103 = vector.load %arg8[%c0_109, %c0_110, %c32_111] : memref<2x8x320xbf16, #tpu.memory_space<vmem>>, vector<1x8x256xbf16>
    %104 = vector.shape_cast %103 : vector<1x8x256xbf16> to vector<8x256xbf16>
    %105 = vector.shape_cast %102 : vector<8x256xbf16> to vector<1x8x256xbf16>
    tpu.vector_store %arg8[%c0_109, %c0_110, %c32_111], %105 {strides = array<i32>} : memref<2x8x320xbf16, #tpu.memory_space<vmem>>, vector<1x8x256xbf16>,
    %106 = vector.extract_strided_slice %98 {offsets = [0, 256], sizes = [8, 256], strides = [1, 1]} : vector<8x512xbf16> to vector<8x256xbf16>
    %c1_112 = arith.constant 1 : index
    %c0_113 = arith.constant 0 : index
    %c32_114 = arith.constant 32 : index
    %107 = vector.load %arg8[%c1_112, %c0_113, %c32_114] : memref<2x8x320xbf16, #tpu.memory_space<vmem>>, vector<1x8x256xbf16>
    %108 = vector.shape_cast %107 : vector<1x8x256xbf16> to vector<8x256xbf16>
    %109 = vector.shape_cast %106 : vector<8x256xbf16> to vector<1x8x256xbf16>
    tpu.vector_store %arg8[%c1_112, %c0_113, %c32_114], %109 {strides = array<i32>} : memref<2x8x320xbf16, #tpu.memory_space<vmem>>, vector<1x8x256xbf16>,
    %c0_115 = arith.constant 0 : index
    %c0_116 = arith.constant 0 : index
    %c15_117 = arith.constant 15 : index
    %110 = vector.load %arg8[%c0_115, %c0_116, %c15_117] : memref<2x8x320xbf16, #tpu.memory_space<vmem>>, vector<1x8x256xbf16>
    %111 = vector.shape_cast %110 : vector<1x8x256xbf16> to vector<8x256xbf16>
    %c0_118 = arith.constant 0 : index
    %c0_119 = arith.constant 0 : index
    %112 = vector.load %arg6[%c0_118, %c0_119] : memref<2x256xbf16, #tpu.memory_space<vmem>>, vector<1x256xbf16>
    %113 = vector.broadcast %112 : vector<1x256xbf16> to vector<8x256xbf16>
    %114 = arith.mulf %111, %113 : vector<8x256xbf16>
    %c0_120 = arith.constant 0 : index
    %c0_121 = arith.constant 0 : index
    %115 = vector.load %arg10[%c0_120, %c0_121] : memref<72x512xbf16, #tpu.memory_space<vmem>>, vector<8x256xbf16>
    tpu.vector_store %arg10[%c0_120, %c0_121], %114 {strides = array<i32>} : memref<72x512xbf16, #tpu.memory_space<vmem>>, vector<8x256xbf16>,
    %c1_122 = arith.constant 1 : index
    %c0_123 = arith.constant 0 : index
    %c15_124 = arith.constant 15 : index
    %116 = vector.load %arg8[%c1_122, %c0_123, %c15_124] : memref<2x8x320xbf16, #tpu.memory_space<vmem>>, vector<1x8x256xbf16>
    %117 = vector.shape_cast %116 : vector<1x8x256xbf16> to vector<8x256xbf16>
    %c0_125 = arith.constant 0 : index
    %c0_126 = arith.constant 0 : index
    %118 = vector.load %arg6[%c0_125, %c0_126] : memref<2x256xbf16, #tpu.memory_space<vmem>>, vector<1x256xbf16>
    %119 = vector.broadcast %118 : vector<1x256xbf16> to vector<8x256xbf16>
    %120 = arith.mulf %117, %119 : vector<8x256xbf16>
    %c0_127 = arith.constant 0 : index
    %c256_128 = arith.constant 256 : index
    %121 = vector.load %arg10[%c0_127, %c256_128] : memref<72x512xbf16, #tpu.memory_space<vmem>>, vector<8x256xbf16>
    tpu.vector_store %arg10[%c0_127, %c256_128], %120 {strides = array<i32>} : memref<72x512xbf16, #tpu.memory_space<vmem>>, vector<8x256xbf16>,
    %c0_129 = arith.constant 0 : index
    %c0_130 = arith.constant 0 : index
    %c16_131 = arith.constant 16 : index
    %122 = vector.load %arg8[%c0_129, %c0_130, %c16_131] : memref<2x8x320xbf16, #tpu.memory_space<vmem>>, vector<1x8x256xbf16>
    %123 = vector.shape_cast %122 : vector<1x8x256xbf16> to vector<8x256xbf16>
    %c8_132 = arith.constant 8 : index
    %c0_133 = arith.constant 0 : index
    %124 = vector.load %arg10[%c8_132, %c0_133] : memref<72x512xbf16, #tpu.memory_space<vmem>>, vector<8x256xbf16>
    tpu.vector_store %arg10[%c8_132, %c0_133], %123 {strides = array<i32>} : memref<72x512xbf16, #tpu.memory_space<vmem>>, vector<8x256xbf16>,
    %c1_134 = arith.constant 1 : index
    %c0_135 = arith.constant 0 : index
    %c16_136 = arith.constant 16 : index
    %125 = vector.load %arg8[%c1_134, %c0_135, %c16_136] : memref<2x8x320xbf16, #tpu.memory_space<vmem>>, vector<1x8x256xbf16>
    %126 = vector.shape_cast %125 : vector<1x8x256xbf16> to vector<8x256xbf16>
    %c8_137 = arith.constant 8 : index
    %c256_138 = arith.constant 256 : index
    %127 = vector.load %arg10[%c8_137, %c256_138] : memref<72x512xbf16, #tpu.memory_space<vmem>>, vector<8x256xbf16>
    tpu.vector_store %arg10[%c8_137, %c256_138], %126 {strides = array<i32>} : memref<72x512xbf16, #tpu.memory_space<vmem>>, vector<8x256xbf16>,
    %c0_139 = arith.constant 0 : index
    %c0_140 = arith.constant 0 : index
    %c17_141 = arith.constant 17 : index
    %128 = vector.load %arg8[%c0_139, %c0_140, %c17_141] : memref<2x8x320xbf16, #tpu.memory_space<vmem>>, vector<1x8x256xbf16>
    %129 = vector.shape_cast %128 : vector<1x8x256xbf16> to vector<8x256xbf16>
    %c1_142 = arith.constant 1 : index
    %c0_143 = arith.constant 0 : index
    %130 = vector.load %arg6[%c1_142, %c0_143] : memref<2x256xbf16, #tpu.memory_space<vmem>>, vector<1x256xbf16>
    %131 = vector.broadcast %130 : vector<1x256xbf16> to vector<8x256xbf16>
    %132 = arith.mulf %129, %131 : vector<8x256xbf16>
    %c16_144 = arith.constant 16 : index
    %c0_145 = arith.constant 0 : index
    %133 = vector.load %arg10[%c16_144, %c0_145] : memref<72x512xbf16, #tpu.memory_space<vmem>>, vector<8x256xbf16>
    tpu.vector_store %arg10[%c16_144, %c0_145], %132 {strides = array<i32>} : memref<72x512xbf16, #tpu.memory_space<vmem>>, vector<8x256xbf16>,
    %c1_146 = arith.constant 1 : index
    %c0_147 = arith.constant 0 : index
    %c17_148 = arith.constant 17 : index
    %134 = vector.load %arg8[%c1_146, %c0_147, %c17_148] : memref<2x8x320xbf16, #tpu.memory_space<vmem>>, vector<1x8x256xbf16>
    %135 = vector.shape_cast %134 : vector<1x8x256xbf16> to vector<8x256xbf16>
    %c1_149 = arith.constant 1 : index
    %c0_150 = arith.constant 0 : index
    %136 = vector.load %arg6[%c1_149, %c0_150] : memref<2x256xbf16, #tpu.memory_space<vmem>>, vector<1x256xbf16>
    %137 = vector.broadcast %136 : vector<1x256xbf16> to vector<8x256xbf16>
    %138 = arith.mulf %135, %137 : vector<8x256xbf16>
    %c16_151 = arith.constant 16 : index
    %c256_152 = arith.constant 256 : index
    %139 = vector.load %arg10[%c16_151, %c256_152] : memref<72x512xbf16, #tpu.memory_space<vmem>>, vector<8x256xbf16>
    tpu.vector_store %arg10[%c16_151, %c256_152], %138 {strides = array<i32>} : memref<72x512xbf16, #tpu.memory_space<vmem>>, vector<8x256xbf16>,
    %c0_153 = arith.constant 0 : index
    %c0_154 = arith.constant 0 : index
    %c31_155 = arith.constant 31 : index
    %140 = vector.load %arg8[%c0_153, %c0_154, %c31_155] : memref<2x8x320xbf16, #tpu.memory_space<vmem>>, vector<1x8x256xbf16>
    %141 = vector.shape_cast %140 : vector<1x8x256xbf16> to vector<8x256xbf16>
    %c0_156 = arith.constant 0 : index
    %c0_157 = arith.constant 0 : index
    %142 = vector.load %arg6[%c0_156, %c0_157] : memref<2x256xbf16, #tpu.memory_space<vmem>>, vector<1x256xbf16>
    %143 = vector.broadcast %142 : vector<1x256xbf16> to vector<8x256xbf16>
    %144 = arith.mulf %141, %143 : vector<8x256xbf16>
    %c24_158 = arith.constant 24 : index
    %c0_159 = arith.constant 0 : index
    %145 = vector.load %arg10[%c24_158, %c0_159] : memref<72x512xbf16, #tpu.memory_space<vmem>>, vector<8x256xbf16>
    tpu.vector_store %arg10[%c24_158, %c0_159], %144 {strides = array<i32>} : memref<72x512xbf16, #tpu.memory_space<vmem>>, vector<8x256xbf16>,
    %c1_160 = arith.constant 1 : index
    %c0_161 = arith.constant 0 : index
    %c31_162 = arith.constant 31 : index
    %146 = vector.load %arg8[%c1_160, %c0_161, %c31_162] : memref<2x8x320xbf16, #tpu.memory_space<vmem>>, vector<1x8x256xbf16>
    %147 = vector.shape_cast %146 : vector<1x8x256xbf16> to vector<8x256xbf16>
    %c0_163 = arith.constant 0 : index
    %c0_164 = arith.constant 0 : index
    %148 = vector.load %arg6[%c0_163, %c0_164] : memref<2x256xbf16, #tpu.memory_space<vmem>>, vector<1x256xbf16>
    %149 = vector.broadcast %148 : vector<1x256xbf16> to vector<8x256xbf16>
    %150 = arith.mulf %147, %149 : vector<8x256xbf16>
    %c24_165 = arith.constant 24 : index
    %c256_166 = arith.constant 256 : index
    %151 = vector.load %arg10[%c24_165, %c256_166] : memref<72x512xbf16, #tpu.memory_space<vmem>>, vector<8x256xbf16>
    tpu.vector_store %arg10[%c24_165, %c256_166], %150 {strides = array<i32>} : memref<72x512xbf16, #tpu.memory_space<vmem>>, vector<8x256xbf16>,
    %c0_167 = arith.constant 0 : index
    %c0_168 = arith.constant 0 : index
    %c32_169 = arith.constant 32 : index
    %152 = vector.load %arg8[%c0_167, %c0_168, %c32_169] : memref<2x8x320xbf16, #tpu.memory_space<vmem>>, vector<1x8x256xbf16>
    %153 = vector.shape_cast %152 : vector<1x8x256xbf16> to vector<8x256xbf16>
    %c32_170 = arith.constant 32 : index
    %c0_171 = arith.constant 0 : index
    %154 = vector.load %arg10[%c32_170, %c0_171] : memref<72x512xbf16, #tpu.memory_space<vmem>>, vector<8x256xbf16>
    tpu.vector_store %arg10[%c32_170, %c0_171], %153 {strides = array<i32>} : memref<72x512xbf16, #tpu.memory_space<vmem>>, vector<8x256xbf16>,
    %c1_172 = arith.constant 1 : index
    %c0_173 = arith.constant 0 : index
    %c32_174 = arith.constant 32 : index
    %155 = vector.load %arg8[%c1_172, %c0_173, %c32_174] : memref<2x8x320xbf16, #tpu.memory_space<vmem>>, vector<1x8x256xbf16>
    %156 = vector.shape_cast %155 : vector<1x8x256xbf16> to vector<8x256xbf16>
    %c32_175 = arith.constant 32 : index
    %c256_176 = arith.constant 256 : index
    %157 = vector.load %arg10[%c32_175, %c256_176] : memref<72x512xbf16, #tpu.memory_space<vmem>>, vector<8x256xbf16>
    tpu.vector_store %arg10[%c32_175, %c256_176], %156 {strides = array<i32>} : memref<72x512xbf16, #tpu.memory_space<vmem>>, vector<8x256xbf16>,
    %c0_177 = arith.constant 0 : index
    %c0_178 = arith.constant 0 : index
    %c33_179 = arith.constant 33 : index
    %158 = vector.load %arg8[%c0_177, %c0_178, %c33_179] : memref<2x8x320xbf16, #tpu.memory_space<vmem>>, vector<1x8x256xbf16>
    %159 = vector.shape_cast %158 : vector<1x8x256xbf16> to vector<8x256xbf16>
    %c1_180 = arith.constant 1 : index
    %c0_181 = arith.constant 0 : index
    %160 = vector.load %arg6[%c1_180, %c0_181] : memref<2x256xbf16, #tpu.memory_space<vmem>>, vector<1x256xbf16>
    %161 = vector.broadcast %160 : vector<1x256xbf16> to vector<8x256xbf16>
    %162 = arith.mulf %159, %161 : vector<8x256xbf16>
    %c40 = arith.constant 40 : index
    %c0_182 = arith.constant 0 : index
    %163 = vector.load %arg10[%c40, %c0_182] : memref<72x512xbf16, #tpu.memory_space<vmem>>, vector<8x256xbf16>
    tpu.vector_store %arg10[%c40, %c0_182], %162 {strides = array<i32>} : memref<72x512xbf16, #tpu.memory_space<vmem>>, vector<8x256xbf16>,
    %c1_183 = arith.constant 1 : index
    %c0_184 = arith.constant 0 : index
    %c33_185 = arith.constant 33 : index
    %164 = vector.load %arg8[%c1_183, %c0_184, %c33_185] : memref<2x8x320xbf16, #tpu.memory_space<vmem>>, vector<1x8x256xbf16>
    %165 = vector.shape_cast %164 : vector<1x8x256xbf16> to vector<8x256xbf16>
    %c1_186 = arith.constant 1 : index
    %c0_187 = arith.constant 0 : index
    %166 = vector.load %arg6[%c1_186, %c0_187] : memref<2x256xbf16, #tpu.memory_space<vmem>>, vector<1x256xbf16>
    %167 = vector.broadcast %166 : vector<1x256xbf16> to vector<8x256xbf16>
    %168 = arith.mulf %165, %167 : vector<8x256xbf16>
    %c40_188 = arith.constant 40 : index
    %c256_189 = arith.constant 256 : index
    %169 = vector.load %arg10[%c40_188, %c256_189] : memref<72x512xbf16, #tpu.memory_space<vmem>>, vector<8x256xbf16>
    tpu.vector_store %arg10[%c40_188, %c256_189], %168 {strides = array<i32>} : memref<72x512xbf16, #tpu.memory_space<vmem>>, vector<8x256xbf16>,
    %c0_190 = arith.constant 0 : index
    %c0_191 = arith.constant 0 : index
    %c47_192 = arith.constant 47 : index
    %170 = vector.load %arg8[%c0_190, %c0_191, %c47_192] : memref<2x8x320xbf16, #tpu.memory_space<vmem>>, vector<1x8x256xbf16>
    %171 = vector.shape_cast %170 : vector<1x8x256xbf16> to vector<8x256xbf16>
    %c0_193 = arith.constant 0 : index
    %c0_194 = arith.constant 0 : index
    %172 = vector.load %arg6[%c0_193, %c0_194] : memref<2x256xbf16, #tpu.memory_space<vmem>>, vector<1x256xbf16>
    %173 = vector.broadcast %172 : vector<1x256xbf16> to vector<8x256xbf16>
    %174 = arith.mulf %171, %173 : vector<8x256xbf16>
    %c48_195 = arith.constant 48 : index
    %c0_196 = arith.constant 0 : index
    %175 = vector.load %arg10[%c48_195, %c0_196] : memref<72x512xbf16, #tpu.memory_space<vmem>>, vector<8x256xbf16>
    tpu.vector_store %arg10[%c48_195, %c0_196], %174 {strides = array<i32>} : memref<72x512xbf16, #tpu.memory_space<vmem>>, vector<8x256xbf16>,
    %c1_197 = arith.constant 1 : index
    %c0_198 = arith.constant 0 : index
    %c47_199 = arith.constant 47 : index
    %176 = vector.load %arg8[%c1_197, %c0_198, %c47_199] : memref<2x8x320xbf16, #tpu.memory_space<vmem>>, vector<1x8x256xbf16>
    %177 = vector.shape_cast %176 : vector<1x8x256xbf16> to vector<8x256xbf16>
    %c0_200 = arith.constant 0 : index
    %c0_201 = arith.constant 0 : index
    %178 = vector.load %arg6[%c0_200, %c0_201] : memref<2x256xbf16, #tpu.memory_space<vmem>>, vector<1x256xbf16>
    %179 = vector.broadcast %178 : vector<1x256xbf16> to vector<8x256xbf16>
    %180 = arith.mulf %177, %179 : vector<8x256xbf16>
    %c48_202 = arith.constant 48 : index
    %c256_203 = arith.constant 256 : index
    %181 = vector.load %arg10[%c48_202, %c256_203] : memref<72x512xbf16, #tpu.memory_space<vmem>>, vector<8x256xbf16>
    tpu.vector_store %arg10[%c48_202, %c256_203], %180 {strides = array<i32>} : memref<72x512xbf16, #tpu.memory_space<vmem>>, vector<8x256xbf16>,
    %c0_204 = arith.constant 0 : index
    %c0_205 = arith.constant 0 : index
    %c48_206 = arith.constant 48 : index
    %182 = vector.load %arg8[%c0_204, %c0_205, %c48_206] : memref<2x8x320xbf16, #tpu.memory_space<vmem>>, vector<1x8x256xbf16>
    %183 = vector.shape_cast %182 : vector<1x8x256xbf16> to vector<8x256xbf16>
    %c56 = arith.constant 56 : index
    %c0_207 = arith.constant 0 : index
    %184 = vector.load %arg10[%c56, %c0_207] : memref<72x512xbf16, #tpu.memory_space<vmem>>, vector<8x256xbf16>
    tpu.vector_store %arg10[%c56, %c0_207], %183 {strides = array<i32>} : memref<72x512xbf16, #tpu.memory_space<vmem>>, vector<8x256xbf16>,
    %c1_208 = arith.constant 1 : index
    %c0_209 = arith.constant 0 : index
    %c48_210 = arith.constant 48 : index
    %185 = vector.load %arg8[%c1_208, %c0_209, %c48_210] : memref<2x8x320xbf16, #tpu.memory_space<vmem>>, vector<1x8x256xbf16>
    %186 = vector.shape_cast %185 : vector<1x8x256xbf16> to vector<8x256xbf16>
    %c56_211 = arith.constant 56 : index
    %c256_212 = arith.constant 256 : index
    %187 = vector.load %arg10[%c56_211, %c256_212] : memref<72x512xbf16, #tpu.memory_space<vmem>>, vector<8x256xbf16>
    tpu.vector_store %arg10[%c56_211, %c256_212], %186 {strides = array<i32>} : memref<72x512xbf16, #tpu.memory_space<vmem>>, vector<8x256xbf16>,
    %c0_213 = arith.constant 0 : index
    %c0_214 = arith.constant 0 : index
    %c49_215 = arith.constant 49 : index
    %188 = vector.load %arg8[%c0_213, %c0_214, %c49_215] : memref<2x8x320xbf16, #tpu.memory_space<vmem>>, vector<1x8x256xbf16>
    %189 = vector.shape_cast %188 : vector<1x8x256xbf16> to vector<8x256xbf16>
    %c1_216 = arith.constant 1 : index
    %c0_217 = arith.constant 0 : index
    %190 = vector.load %arg6[%c1_216, %c0_217] : memref<2x256xbf16, #tpu.memory_space<vmem>>, vector<1x256xbf16>
    %191 = vector.broadcast %190 : vector<1x256xbf16> to vector<8x256xbf16>
    %192 = arith.mulf %189, %191 : vector<8x256xbf16>
    %c64 = arith.constant 64 : index
    %c0_218 = arith.constant 0 : index
    %193 = vector.load %arg10[%c64, %c0_218] : memref<72x512xbf16, #tpu.memory_space<vmem>>, vector<8x256xbf16>
    tpu.vector_store %arg10[%c64, %c0_218], %192 {strides = array<i32>} : memref<72x512xbf16, #tpu.memory_space<vmem>>, vector<8x256xbf16>,
    %c1_219 = arith.constant 1 : index
    %c0_220 = arith.constant 0 : index
    %c49_221 = arith.constant 49 : index
    %194 = vector.load %arg8[%c1_219, %c0_220, %c49_221] : memref<2x8x320xbf16, #tpu.memory_space<vmem>>, vector<1x8x256xbf16>
    %195 = vector.shape_cast %194 : vector<1x8x256xbf16> to vector<8x256xbf16>
    %c1_222 = arith.constant 1 : index
    %c0_223 = arith.constant 0 : index
    %196 = vector.load %arg6[%c1_222, %c0_223] : memref<2x256xbf16, #tpu.memory_space<vmem>>, vector<1x256xbf16>
    %197 = vector.broadcast %196 : vector<1x256xbf16> to vector<8x256xbf16>
    %198 = arith.mulf %195, %197 : vector<8x256xbf16>
    %c64_224 = arith.constant 64 : index
    %c256_225 = arith.constant 256 : index
    %199 = vector.load %arg10[%c64_224, %c256_225] : memref<72x512xbf16, #tpu.memory_space<vmem>>, vector<8x256xbf16>
    tpu.vector_store %arg10[%c64_224, %c256_225], %198 {strides = array<i32>} : memref<72x512xbf16, #tpu.memory_space<vmem>>, vector<8x256xbf16>,
    %c0_226 = arith.constant 0 : index
    %c0_227 = arith.constant 0 : index
    %200 = vector.load %arg4[%c0_226, %c0_227] : memref<4x72xbf16, #tpu.memory_space<vmem>>, vector<4x72xbf16>
    %c0_228 = arith.constant 0 : index
    %c0_229 = arith.constant 0 : index
    %201 = vector.load %arg10[%c0_228, %c0_229] : memref<72x512xbf16, #tpu.memory_space<vmem>>, vector<72x512xbf16>
    %cst_230 = arith.constant dense<0.000000e+00> : vector<4x512xf32>
    %202 = tpu.matmul %200, %201, %cst_230 {dimension_numbers = #tpu.dot_dimension_numbers<[1], [0], [0], [1], [0, 0, 1, 1], [], []>} : vector<4x72xbf16>, vector<72x512xbf16>, vector<4x512xf32> -> vector<4x512xf32>
    %c0_231 = arith.constant 0 : index
    %c0_232 = arith.constant 0 : index
    %c32_233 = arith.constant 32 : index
    %203 = vector.load %arg1[%c0_231, %c0_232, %c32_233] : memref<2x4x320xbf16, #tpu.memory_space<vmem>>, vector<1x4x256xbf16>
    %204 = vector.shape_cast %203 : vector<1x4x256xbf16> to vector<4x256xbf16>
    %205 = arith.extf %204 : vector<4x256xbf16> to vector<4x256xf32>
    %206 = vector.extract_strided_slice %202 {offsets = [0, 0], sizes = [4, 256], strides = [1, 1]} : vector<4x512xf32> to vector<4x256xf32>
    %c0_234 = arith.constant 0 : index
    %c0_235 = arith.constant 0 : index
    %207 = vector.load %arg5[%c0_234, %c0_235] : memref<4x1xf32, #tpu.memory_space<vmem>>, vector<4x1xf32>
    %208 = vector.broadcast %207 : vector<4x1xf32> to vector<4x256xf32>
    %209 = arith.addf %206, %208 : vector<4x256xf32>
    %210 = arith.addf %209, %205 : vector<4x256xf32>
    %cst_236 = arith.constant 0.000000e+00 : f32
    %211 = vector.broadcast %cst_236 : f32 to vector<4x256xf32>
    %212 = arith.maximumf %210, %211 : vector<4x256xf32>
    %c0_237 = arith.constant 0 : index
    %c0_238 = arith.constant 0 : index
    %c0_239 = arith.constant 0 : index
    %213 = vector.load %arg7[%c0_237, %c0_238, %c0_239] : memref<2x4x256xf32, #tpu.memory_space<vmem>>, vector<1x4x256xf32>
    %214 = vector.shape_cast %213 : vector<1x4x256xf32> to vector<4x256xf32>
    %215 = vector.shape_cast %212 : vector<4x256xf32> to vector<1x4x256xf32>
    tpu.vector_store %arg7[%c0_237, %c0_238, %c0_239], %215 {strides = array<i32>} : memref<2x4x256xf32, #tpu.memory_space<vmem>>, vector<1x4x256xf32>,
    %c1_240 = arith.constant 1 : index
    %c0_241 = arith.constant 0 : index
    %c32_242 = arith.constant 32 : index
    %216 = vector.load %arg1[%c1_240, %c0_241, %c32_242] : memref<2x4x320xbf16, #tpu.memory_space<vmem>>, vector<1x4x256xbf16>
    %217 = vector.shape_cast %216 : vector<1x4x256xbf16> to vector<4x256xbf16>
    %218 = arith.extf %217 : vector<4x256xbf16> to vector<4x256xf32>
    %219 = vector.extract_strided_slice %202 {offsets = [0, 256], sizes = [4, 256], strides = [1, 1]} : vector<4x512xf32> to vector<4x256xf32>
    %c0_243 = arith.constant 0 : index
    %c0_244 = arith.constant 0 : index
    %220 = vector.load %arg5[%c0_243, %c0_244] : memref<4x1xf32, #tpu.memory_space<vmem>>, vector<4x1xf32>
    %221 = vector.broadcast %220 : vector<4x1xf32> to vector<4x256xf32>
    %222 = arith.addf %219, %221 : vector<4x256xf32>
    %223 = arith.addf %222, %218 : vector<4x256xf32>
    %cst_245 = arith.constant 0.000000e+00 : f32
    %224 = vector.broadcast %cst_245 : f32 to vector<4x256xf32>
    %225 = arith.maximumf %223, %224 : vector<4x256xf32>
    %c1_246 = arith.constant 1 : index
    %c0_247 = arith.constant 0 : index
    %c0_248 = arith.constant 0 : index
    %226 = vector.load %arg7[%c1_246, %c0_247, %c0_248] : memref<2x4x256xf32, #tpu.memory_space<vmem>>, vector<1x4x256xf32>
    %227 = vector.shape_cast %226 : vector<1x4x256xf32> to vector<4x256xf32>
    %228 = vector.shape_cast %225 : vector<4x256xf32> to vector<1x4x256xf32>
    tpu.vector_store %arg7[%c1_246, %c0_247, %c0_248], %228 {strides = array<i32>} : memref<2x4x256xf32, #tpu.memory_space<vmem>>, vector<1x4x256xf32>,
    return
  }
  func.func @transform_0(%arg0: i32) -> (i32, i32, i32) {
    %c0_i32 = arith.constant 0 : i32
    %c0_i32_0 = arith.constant 0 : i32
    %c0_i32_1 = arith.constant 0 : i32
    return %arg0, %c0_i32, %c0_i32_0 : i32, i32, i32
  }
  func.func @transform_1(%arg0: i32) -> (i32, i32) {
    %c0_i32 = arith.constant 0 : i32
    %c0_i32_0 = arith.constant 0 : i32
    %c0_i32_1 = arith.constant 0 : i32
    return %c0_i32, %c0_i32_0 : i32, i32
  }
  func.func @transform_2(%arg0: i32) -> (i32, i32) {
    %c0_i32 = arith.constant 0 : i32
    %c0_i32_0 = arith.constant 0 : i32
    %c0_i32_1 = arith.constant 0 : i32
    return %c0_i32, %c0_i32_0 : i32, i32
  }
  func.func @transform_3(%arg0: i32) -> (i32, i32) {
    %c0_i32 = arith.constant 0 : i32
    %c0_i32_0 = arith.constant 0 : i32
    %c0_i32_1 = arith.constant 0 : i32
    return %c0_i32, %c0_i32_0 : i32, i32
  }
  func.func @transform_4(%arg0: i32) -> (i32, i32) {
    %c0_i32 = arith.constant 0 : i32
    %c0_i32_0 = arith.constant 0 : i32
    %c0_i32_1 = arith.constant 0 : i32
    return %c0_i32, %c0_i32_0 : i32, i32
  }
  func.func @transform_5(%arg0: i32) -> (i32, i32) {
    %c0_i32 = arith.constant 0 : i32
    %c0_i32_0 = arith.constant 0 : i32
    %c0_i32_1 = arith.constant 0 : i32
    return %c0_i32, %c0_i32_0 : i32, i32
  }
  func.func @transform_6(%arg0: i32) -> (i32, i32, i32) {
    %c0_i32 = arith.constant 0 : i32
    %c0_i32_0 = arith.constant 0 : i32
    %c0_i32_1 = arith.constant 0 : i32
    return %arg0, %c0_i32, %c0_i32_0 : i32, i32, i32
  }
}

</mosaic_0001>

<bundles_post_ra>
// kernel: tpu_custom_call.1
= control target key start
LH: loop header
LB: loop body
LE: loop exit
PB: predicated region body
PF: predicated region fallthrough
CT: control target
= control target key end

     0   :  { %11 = vsyncpa [#allocation6], 0  ;;  %s2930_s0 = inlined_call_operand.vmem [shape: bf16[2,4,320], index: 0, kind: input, shape index: {}]   ;;  %s2931_s1 = inlined_call_operand.hbm [shape: bf16[8,36], index: 1, kind: input, shape index: {}]   ;;  %s2932_s2 = inlined_call_operand.vmem [shape: f32[8,1], index: 2, kind: input, shape index: {}]   ;;  %s2933_s3 = inlined_call_operand.hbm [shape: bf16[4,72], index: 3, kind: input, shape index: {}]   ;;  %s2934_s4 = inlined_call_operand.vmem [shape: f32[4,1], index: 4, kind: input, shape index: {}]   ;;  %s2935_s5 = inlined_call_operand.vmem [shape: bf16[2,256], index: 5, kind: input, shape index: {}]   ;;  %s2936_s6 = inlined_call_operand.hbm [shape: f32[2,4,256], index: 6, kind: output, shape index: {}]  }
   0x1   :  { %12 = vsyncpa [#allocation9], 0 }
   0x2   :  { %13 = vsyncpa [#allocation7], 0  ;;  %s21_s23 = sshll.u32 %s2931_s1, 4  ;;  %s2218_s24 = smov [#allocation5]   ;;  %s22_s23 = int_to_ptr.hbm [resolvable:$true] %s21_s23 }
   0x3   :  { %s23_s25 = sshll.u32 %s2218_s24, 4  ;;  %s34_s28 = sshll.u32 %s2933_s3, 4  ;;  %s24_s25 = int_to_ptr.vmem [resolvable:$true] %s23_s25  ;;  %s35_s28 = int_to_ptr.hbm [resolvable:$true] %s34_s28 }
   0x4   :  { %26 = dma.hbm_to_vmem [thread:$0]  %s22_s23, 64, %s24_s25, [#allocation6]  }
   0x5   :  { %s2219_s29 = smov [#allocation8]  }
   0x6   :  { %s36_s30 = sshll.u32 %s2219_s29, 4  ;;  %s37_s30 = int_to_ptr.vmem [resolvable:$true] %s36_s30 }
   0x7   :  { %39 = dma.hbm_to_vmem [thread:$0]  %s35_s28, 32, %s37_s30, [#allocation9]  }
   0x8   :  { %2212 = dma.done.wait [#allocation6], 64  }
   0x9   :  { %2213 = vsyncadd [#allocation6], 4294967232 }
   0xa   :  { %2214 = dma.done.wait [#allocation9], 32  }
   0xb   :  { %2215 = vsyncadd [#allocation9], 4294967264  ;;  %v54_v0 = vld [vmem:[%s2935_s5] sm:$0x3]  ;;  %vm72_vm0 = vcmask 1043456   ;;  %s2220_s3 = smov 15  }
   0xc   :  { %56 = vst [vmem:[#allocation1] ss:$9 sm:$0xff] %v54_v0  ;;  %v53_v11 = vld [vmem:[%s2930_s0] sm:$0x3f]  ;;  %vm77_vm1 = vcmask 121856   ;;  %s2221_s20 = smov 17  }
   0xd   :  { %v66_v12 = vunpack.c.h.bf16 %v53_v11  ;;  %v65_v14 = vunpack.c.l.bf16 %v53_v11  ;;  %v112_v19 = vld [vmem:[%s2935_s5] sm:$0x3]  ;;  %v1917_v33 = vld [vmem:[%s2930_s0 + $0x6] sm:$0x3f]  ;;  %vm226_vm2 = vcmask 138240   ;;  %s2222_s29 = smov 31  }
   0xe   :  { %v124_v34 = vunpack.c.h.bf16 %v1917_v33  ;;  %v123_v35 = vunpack.c.l.bf16 %v1917_v33  ;;  %v164_v41 = vld [vmem:[%s2930_s0] sm:$0x3f]  ;;  %v1918_v44 = vld [vmem:[%s2930_s0 + $0x6] sm:$0x3f]  ;;  %vm336_vm3 = vcmask 252928   ;;  %s2223_s17 = smov 33  }
   0xf   :  { %v202_v47 = vld [vmem:[%s2935_s5] sm:$0x3]  ;;  %vm485_vm4 = vcmask 269312   ;;  %s2224_s27 = smov 47   ;;  %s2225_s28 = smov 96   ;;  %vm599_vm5 = vcmask 384000  }
  0x10   :  { %v201_v63 = vld [vmem:[%s2930_s0] sm:$0x3f]  ;;  %s2226_s30 = smov 95   ;;  %s2227_s14 = smov 81   ;;  %vm439_vm6 = vcmask 785408   ;;  %vm746_vm7 = vcmask 400384  }
  0x11   :  { %v216_v0 = vunpack.c.h.bf16 %v201_v63  ;;  %s2228_s21 = smov 80   ;;  %s2229_s22 = smov 112   ;;  %vm515_vm8 = vcmask 777216   ;;  %vm2937_vm9 = vcmask 662528   ;;  %vm2940_vm10 = vcmask 916480  }
  0x12   :  { %s2230_s23 = smov 111   ;;  %s2231_s24 = smov 49   ;;  %vm774_vm11 = vcmask 646144   ;;  %vm699_vm12 = vcmask 654336   ;;  %vm2938_vm13 = vcmask 924672   ;;  %vm904_vm14 = vcmask 1041408  }
  0x13   :  { %v57_v1 = vld [vmem:[#allocation1] sm:$0xff]  ;;  %v58_v2 = vld [vmem:[#allocation1 + $0x9] sm:$0xff]  ;;  %s2232_s25 = smov 113   ;;  %s2233_s26 = smov 97   ;;  %vm2941_vm15 = vcmask 908288  }
  0x14   :  { %v59_v3 = vpack.i.b16 %v57_v1, %v57_v1  ;;  %v62_v4 = vpack.i.b16 %v58_v2, %v58_v2  ;;  %v215_v1 = vunpack.c.l.bf16 %v201_v63  ;;  %v371_v63 = vld [vmem:[%s2935_s5] sm:$0x3]  ;;  %s2234_s10 = smov 79   ;;  %s2238_s12 = smov 128  }
  0x15   :  { %s2239_s13 = smov 8  }
  0x16   :  { %v61_v5 = vperm.slane %v59_v3, 0  ;;  %v64_v6 = vperm.slane %v62_v4, 0 }
  0x18   :  { %v67_v7 = vunpack.c.l.bf16 %v61_v5  ;;  %v68_v8 = vunpack.c.l.bf16 %v64_v6 }
  0x1a   :  { %v71_v9 = vrot.slane %v68_v8, 4 }
  0x1c   :  { %v73_v10 = vsel %vm72_vm0, %v67_v7, %v71_v9  ;;  %v259_v7 = vld [vmem:[%s2935_s5] sm:$0x3] }
  0x1d   :  { %74 = vrot.lane.b32.xlu0 %v73_v10, %s2220_s3 }
  0x8f   :  { %v75_v13 = vpop.permute.xlu0 %74 }
  0x90   :  { %v76_v15 = vrot.slane %v75_v13, 4 }
  0x92   :  { %v78_v16 = vsel %vm77_vm1, %v76_v15, %v75_v13  ;;  %v82_v17 = vmul.f32 %v76_v15, %v66_v12 }
  0x93   :  { %v81_v18 = vmul.f32 %v78_v16, %v65_v14 }
  0x94   :  { %87 = vst [vmem:[#allocation1 + $0x10] ss:$2 sm:$0xff] %v82_v17 }
  0x95   :  { %85 = vst [vmem:[#allocation1] ss:$2 sm:$0xff] %v81_v18 }
  0x9b   :  { %v2293_v20 = vld.sshfl [vmem:[#allocation1 + $0x10] sm:$0xff pattern:$0x75316420] }
  0x9c   :  { %v2295_v21 = vld.sshfl [vmem:[#allocation1] sm:$0xff pattern:$0x75316420]  ;;  %v2297_v22 = vld.sshfl [vmem:[#allocation1 + $0x8] sm:$0xff pattern:$0x75316420] }
  0x9d   :  { %114 = vst [vmem:[#allocation1] ss:$9 sm:$0xff] %v112_v19 }
  0xa4   :  { %v115_v23 = vld [vmem:[#allocation1] sm:$0xff]  ;;  %v116_v24 = vld [vmem:[#allocation1 + $0x9] sm:$0xff] }
  0xa5   :  { %v117_v25 = vpack.i.b16 %v115_v23, %v115_v23  ;;  %v120_v26 = vpack.i.b16 %v116_v24, %v116_v24 }
  0xa7   :  { %v119_v27 = vperm.slane %v117_v25, 0  ;;  %v122_v28 = vperm.slane %v120_v26, 0  ;;  %v1919_v26 = vld [vmem:[%s2930_s0 + $0x6] sm:$0x3f] }
  0xa9   :  { %v126_v29 = vunpack.c.l.bf16 %v122_v28  ;;  %v125_v30 = vunpack.c.l.bf16 %v119_v27  ;;  %v273_v27 = vunpack.c.h.bf16 %v1919_v26  ;;  %v272_v28 = vunpack.c.l.bf16 %v1919_v26 }
  0xab   :  { %v129_v31 = vrot.slane %v126_v29, 4 }
  0xad   :  { %v130_v32 = vsel %vm72_vm0, %v125_v30, %v129_v31 }
  0xae   :  { %131 = vrot.lane.b32.xlu0 %v130_v32, %s2220_s3 }
 0x120   :  { %v132_v36 = vpop.permute.xlu0 %131 }
 0x121   :  { %v133_v37 = vrot.slane %v132_v36, 4 }
 0x123   :  { %v134_v38 = vsel %vm77_vm1, %v133_v37, %v132_v36  ;;  %v138_v39 = vmul.f32 %v133_v37, %v124_v34  ;;  %v314_v34 = vld [vmem:[%s2935_s5] sm:$0x3] }
 0x124   :  { %v137_v40 = vmul.f32 %v134_v38, %v123_v35 }
 0x125   :  { %143 = vst [vmem:[#allocation1 + $0x10] ss:$2 sm:$0xff] %v138_v39 }
 0x126   :  { %141 = vst [vmem:[#allocation1] ss:$2 sm:$0xff] %v137_v40 }
 0x12c   :  { %v2322_v48 = vld.sshfl [vmem:[#allocation1 + $0x10] sm:$0xff pattern:$0x75316420] }
 0x12d   :  { %v2308_v42 = vld.sshfl [vmem:[#allocation1] sm:$0xff pattern:$0x75316420]  ;;  %v2310_v43 = vld.sshfl [vmem:[#allocation1 + $0x8] sm:$0xff pattern:$0x75316420] }
 0x12e   :  { %167 = vst [vmem:[#allocation1 + $0x1] ss:$2 sm:$0xff] %v164_v41 }
 0x135   :  { %v2315_v45 = vld.sshfl [vmem:[#allocation1] sm:$0xff pattern:$0x75643120]  ;;  %v2317_v46 = vld.sshfl [vmem:[#allocation1 + $0x8] sm:$0xff pattern:$0x75643120] }
 0x136   :  { %186 = vst [vmem:[#allocation1 + $0x1] ss:$2 sm:$0xff] %v1918_v44 }
 0x13d   :  { %v2324_v49 = vld.sshfl [vmem:[#allocation1] sm:$0xff pattern:$0x75643120]  ;;  %v2326_v50 = vld.sshfl [vmem:[#allocation1 + $0x8] sm:$0xff pattern:$0x75643120] }
 0x13e   :  { %204 = vst [vmem:[#allocation1] ss:$9 sm:$0xff] %v202_v47 }
 0x145   :  { %v205_v51 = vld [vmem:[#allocation1] sm:$0xff]  ;;  %v206_v52 = vld [vmem:[#allocation1 + $0x9] sm:$0xff] }
 0x146   :  { %v207_v53 = vshrl.u32 %v205_v51, 16  ;;  %v211_v54 = vshrl.u32 %v206_v52, 16 }
 0x148   :  { %v208_v55 = vpack.i.b16 %v207_v53, %v207_v53  ;;  %v212_v56 = vpack.i.b16 %v211_v54, %v211_v54 }
 0x14a   :  { %v210_v57 = vperm.slane %v208_v55, 0  ;;  %v214_v58 = vperm.slane %v212_v56, 0  ;;  %v313_v55 = vld [vmem:[%s2930_s0] sm:$0x3f] }
 0x14b   :  { %v326_v56 = vunpack.c.h.bf16 %v313_v55 }
 0x14c   :  { %v218_v59 = vunpack.c.l.bf16 %v214_v58  ;;  %v217_v60 = vunpack.c.l.bf16 %v210_v57  ;;  %v325_v57 = vunpack.c.l.bf16 %v313_v55 }
 0x14e   :  { %v221_v61 = vrot.slane %v218_v59, 4 }
 0x150   :  { %v222_v62 = vsel %vm72_vm0, %v217_v60, %v221_v61 }
 0x151   :  { %223 = vrot.lane.b32.xlu1 %v222_v62, %s2221_s20 }
 0x1c3   :  { %v224_v2 = vpop.permute.xlu1 %223 }
 0x1c4   :  { %v225_v3 = vrot.slane %v224_v2, 4 }
 0x1c6   :  { %v227_v4 = vsel %vm226_vm2, %v225_v3, %v224_v2  ;;  %v231_v5 = vmul.f32 %v225_v3, %v216_v0 }
 0x1c7   :  { %v230_v6 = vmul.f32 %v227_v4, %v215_v1 }
 0x1c8   :  { %236 = vst [vmem:[#allocation1 + $0x10] ss:$2 sm:$0xff] %v231_v5 }
 0x1c9   :  { %234 = vst [vmem:[#allocation1] ss:$2 sm:$0xff] %v230_v6 }
 0x1cf   :  { %v2337_v8 = vld.sshfl [vmem:[#allocation1 + $0x10] sm:$0xff pattern:$0x75316420] }
 0x1d0   :  { %v2339_v9 = vld.sshfl [vmem:[#allocation1] sm:$0xff pattern:$0x75316420]  ;;  %v2341_v10 = vld.sshfl [vmem:[#allocation1 + $0x8] sm:$0xff pattern:$0x75316420] }
 0x1d1   :  { %261 = vst [vmem:[#allocation1] ss:$9 sm:$0xff] %v259_v7 }
 0x1d8   :  { %v262_v11 = vld [vmem:[#allocation1] sm:$0xff]  ;;  %v263_v12 = vld [vmem:[#allocation1 + $0x9] sm:$0xff] }
 0x1d9   :  { %v264_v13 = vshrl.u32 %v262_v11, 16  ;;  %v268_v14 = vshrl.u32 %v263_v12, 16 }
 0x1db   :  { %v265_v15 = vpack.i.b16 %v264_v13, %v264_v13  ;;  %v269_v16 = vpack.i.b16 %v268_v14, %v268_v14 }
 0x1dd   :  { %v267_v17 = vperm.slane %v265_v15, 0  ;;  %v271_v18 = vperm.slane %v269_v16, 0  ;;  %v1920_v16 = vld [vmem:[%s2930_s0 + $0x6] sm:$0x3f] }
 0x1df   :  { %v275_v19 = vunpack.c.l.bf16 %v271_v18  ;;  %v274_v23 = vunpack.c.l.bf16 %v267_v17  ;;  %v383_v17 = vunpack.c.h.bf16 %v1920_v16  ;;  %v382_v18 = vunpack.c.l.bf16 %v1920_v16 }
 0x1e1   :  { %v278_v24 = vrot.slane %v275_v19, 4 }
 0x1e3   :  { %v279_v25 = vsel %vm72_vm0, %v274_v23, %v278_v24 }
 0x1e4   :  { %280 = vrot.lane.b32.xlu1 %v279_v25, %s2221_s20 }
 0x256   :  { %v281_v29 = vpop.permute.xlu1 %280 }
 0x257   :  { %v282_v30 = vrot.slane %v281_v29, 4 }
 0x259   :  { %v283_v31 = vsel %vm226_vm2, %v282_v30, %v281_v29  ;;  %v287_v32 = vmul.f32 %v282_v30, %v273_v27  ;;  %v425_v27 = vld [vmem:[%s2930_s0] sm:$0x3f]  ;;  %v1921_v30 = vld [vmem:[%s2930_s0 + $0x6] sm:$0x3f] }
 0x25a   :  { %v286_v33 = vmul.f32 %v283_v31, %v272_v28 }
 0x25b   :  { %292 = vst [vmem:[#allocation1 + $0x10] ss:$2 sm:$0xff] %v287_v32 }
 0x25c   :  { %290 = vst [vmem:[#allocation1] ss:$2 sm:$0xff] %v286_v33  ;;  %v461_v33 = vld [vmem:[%s2935_s5] sm:$0x3] }
 0x262   :  { %v2352_v35 = vld.sshfl [vmem:[#allocation1 + $0x10] sm:$0xff pattern:$0x75316420] }
 0x263   :  { %v2354_v36 = vld.sshfl [vmem:[#allocation1] sm:$0xff pattern:$0x75316420]  ;;  %v2356_v37 = vld.sshfl [vmem:[#allocation1 + $0x8] sm:$0xff pattern:$0x75316420] }
 0x264   :  { %316 = vst [vmem:[#allocation1] ss:$9 sm:$0xff] %v314_v34 }
 0x26b   :  { %v317_v38 = vld [vmem:[#allocation1] sm:$0xff]  ;;  %v318_v39 = vld [vmem:[#allocation1 + $0x9] sm:$0xff] }
 0x26c   :  { %v319_v40 = vpack.i.b16 %v317_v38, %v317_v38  ;;  %v322_v41 = vpack.i.b16 %v318_v39, %v318_v39 }
 0x26e   :  { %v321_v44 = vperm.slane %v319_v40, 0  ;;  %v324_v47 = vperm.slane %v322_v41, 0 }
 0x270   :  { %v328_v51 = vunpack.c.l.bf16 %v324_v47  ;;  %v327_v52 = vunpack.c.l.bf16 %v321_v44 }
 0x272   :  { %v331_v53 = vrot.slane %v328_v51, 4 }
 0x274   :  { %v332_v54 = vsel %vm72_vm0, %v327_v52, %v331_v53 }
 0x275   :  { %333 = vrot.lane.b32.xlu2 %v332_v54, %s2222_s29 }
 0x2cf   :  { %v334_v58 = vpop.permute.xlu2 %333 }
 0x2d0   :  { %v335_v59 = vrot.slane %v334_v58, 4 }
 0x2d2   :  { %v337_v60 = vsel %vm336_vm3, %v335_v59, %v334_v58  ;;  %v341_v61 = vmul.f32 %v335_v59, %v326_v56  ;;  %v460_v59 = vld [vmem:[%s2930_s0] sm:$0x3f] }
 0x2d3   :  { %v340_v62 = vmul.f32 %v337_v60, %v325_v57  ;;  %v475_v60 = vunpack.c.h.bf16 %v460_v59 }
 0x2d4   :  { %346 = vst [vmem:[#allocation1 + $0x10] ss:$2 sm:$0xff] %v341_v61  ;;  %v474_v61 = vunpack.c.l.bf16 %v460_v59 }
 0x2d5   :  { %344 = vst [vmem:[#allocation1] ss:$2 sm:$0xff] %v340_v62 }
 0x2db   :  { %v2367_v0 = vld.sshfl [vmem:[#allocation1 + $0x10] sm:$0xff pattern:$0x75316420] }
 0x2dc   :  { %v2369_v1 = vld.sshfl [vmem:[#allocation1] sm:$0xff pattern:$0x75316420]  ;;  %v2371_v2 = vld.sshfl [vmem:[#allocation1 + $0x8] sm:$0xff pattern:$0x75316420] }
 0x2dd   :  { %373 = vst [vmem:[#allocation1] ss:$9 sm:$0xff] %v371_v63 }
 0x2e4   :  { %v375_v3 = vld [vmem:[#allocation1 + $0x9] sm:$0xff]  ;;  %v374_v4 = vld [vmem:[#allocation1] sm:$0xff] }
 0x2e5   :  { %v376_v5 = vpack.i.b16 %v374_v4, %v374_v4  ;;  %v379_v6 = vpack.i.b16 %v375_v3, %v375_v3 }
 0x2e7   :  { %v378_v7 = vperm.slane %v376_v5, 0  ;;  %v381_v11 = vperm.slane %v379_v6, 0  ;;  %v520_v6 = vld [vmem:[%s2935_s5] sm:$0x3] }
 0x2e9   :  { %v385_v12 = vunpack.c.l.bf16 %v381_v11  ;;  %v384_v13 = vunpack.c.l.bf16 %v378_v7 }
 0x2eb   :  { %v388_v14 = vrot.slane %v385_v12, 4 }
 0x2ed   :  { %v389_v15 = vsel %vm72_vm0, %v384_v13, %v388_v14 }
 0x2ee   :  { %390 = vrot.lane.b32.xlu2 %v389_v15, %s2222_s29 }
 0x348   :  { %v391_v19 = vpop.permute.xlu2 %390 }
 0x349   :  { %v392_v23 = vrot.slane %v391_v19, 4 }
 0x34b   :  { %v393_v24 = vsel %vm336_vm3, %v392_v23, %v391_v19  ;;  %v397_v25 = vmul.f32 %v392_v23, %v383_v17 }
 0x34c   :  { %v396_v26 = vmul.f32 %v393_v24, %v382_v18 }
 0x34d   :  { %402 = vst [vmem:[#allocation1 + $0x10] ss:$2 sm:$0xff] %v397_v25 }
 0x34e   :  { %400 = vst [vmem:[#allocation1] ss:$2 sm:$0xff] %v396_v26 }
 0x354   :  { %v2396_v34 = vld.sshfl [vmem:[#allocation1 + $0x10] sm:$0xff pattern:$0x75316420] }
 0x355   :  { %v2382_v28 = vld.sshfl [vmem:[#allocation1] sm:$0xff pattern:$0x75316420]  ;;  %v2384_v29 = vld.sshfl [vmem:[#allocation1 + $0x8] sm:$0xff pattern:$0x75316420] }
 0x356   :  { %427 = vst [vmem:[#allocation1] ss:$2 sm:$0xff] %v425_v27 }
 0x35d   :  { %v2389_v31 = vld.sshfl [vmem:[#allocation1] sm:$0xff pattern:$0x75643120]  ;;  %v2391_v32 = vld.sshfl [vmem:[#allocation1 + $0x8] sm:$0xff pattern:$0x75643120] }
 0x35e   :  { %445 = vst [vmem:[#allocation1] ss:$2 sm:$0xff] %v1921_v30  ;;  %v1922_v30 = vld [vmem:[%s2930_s0 + $0x6] sm:$0x3f] }
 0x365   :  { %v2398_v38 = vld.sshfl [vmem:[#allocation1] sm:$0xff pattern:$0x75643120]  ;;  %v2400_v39 = vld.sshfl [vmem:[#allocation1 + $0x8] sm:$0xff pattern:$0x75643120] }
 0x366   :  { %463 = vst [vmem:[#allocation1] ss:$9 sm:$0xff] %v461_v33  ;;  %v534_v33 = vunpack.c.h.bf16 %v1922_v30 }
 0x36d   :  { %v465_v40 = vld [vmem:[#allocation1 + $0x9] sm:$0xff]  ;;  %v464_v41 = vld [vmem:[#allocation1] sm:$0xff] }
 0x36e   :  { %v466_v44 = vshrl.u32 %v464_v41, 16  ;;  %v470_v47 = vshrl.u32 %v465_v40, 16  ;;  %v533_v40 = vunpack.c.l.bf16 %v1922_v30 }
 0x370   :  { %v467_v51 = vpack.i.b16 %v466_v44, %v466_v44  ;;  %v471_v52 = vpack.i.b16 %v470_v47, %v470_v47 }
 0x372   :  { %v469_v53 = vperm.slane %v467_v51, 0  ;;  %v473_v54 = vperm.slane %v471_v52, 0 }
 0x374   :  { %v476_v55 = vunpack.c.l.bf16 %v469_v53  ;;  %v477_v56 = vunpack.c.l.bf16 %v473_v54  ;;  %v577_v53 = vld [vmem:[%s2935_s5] sm:$0x3] }
 0x376   :  { %v480_v57 = vrot.slane %v477_v56, 4 }
 0x378   :  { %v481_v58 = vsel %vm72_vm0, %v476_v55, %v480_v57 }
 0x379   :  { %482 = vrot.lane.b32.xlu0 %v481_v58, %s2223_s17 }
 0x3eb   :  { %v483_v62 = vpop.permute.xlu0 %482 }
 0x3ec   :  { %v484_v63 = vrot.slane %v483_v62, 4 }
 0x3ee   :  { %v486_v3 = vsel %vm485_vm4, %v484_v63, %v483_v62  ;;  %v490_v4 = vmul.f32 %v484_v63, %v475_v60 }
 0x3ef   :  { %v489_v5 = vmul.f32 %v486_v3, %v474_v61 }
 0x3f0   :  { %495 = vst [vmem:[#allocation1 + $0x10] ss:$2 sm:$0xff] %v490_v4 }
 0x3f1   :  { %493 = vst [vmem:[#allocation1] ss:$2 sm:$0xff] %v489_v5 }
 0x3f7   :  { %v2411_v7 = vld.sshfl [vmem:[#allocation1 + $0x10] sm:$0xff pattern:$0x75316420] }
 0x3f8   :  { %v2413_v11 = vld.sshfl [vmem:[#allocation1] sm:$0xff pattern:$0x75316420]  ;;  %v2415_v12 = vld.sshfl [vmem:[#allocation1 + $0x8] sm:$0xff pattern:$0x75316420] }
 0x3f9   :  { %522 = vst [vmem:[#allocation1] ss:$9 sm:$0xff] %v520_v6 }
 0x400   :  { %v524_v13 = vld [vmem:[#allocation1 + $0x9] sm:$0xff]  ;;  %v523_v14 = vld [vmem:[#allocation1] sm:$0xff] }
 0x401   :  { %v525_v15 = vshrl.u32 %v523_v14, 16  ;;  %v529_v16 = vshrl.u32 %v524_v13, 16  ;;  %v576_v14 = vld [vmem:[%s2930_s0] sm:$0x3f] }
 0x403   :  { %v526_v17 = vpack.i.b16 %v525_v15, %v525_v15  ;;  %v530_v18 = vpack.i.b16 %v529_v16, %v529_v16  ;;  %v589_v15 = vunpack.c.h.bf16 %v576_v14  ;;  %v588_v16 = vunpack.c.l.bf16 %v576_v14 }
 0x405   :  { %v528_v19 = vperm.slane %v526_v17, 0  ;;  %v532_v23 = vperm.slane %v530_v18, 0 }
 0x407   :  { %v536_v24 = vunpack.c.l.bf16 %v532_v23  ;;  %v535_v25 = vunpack.c.l.bf16 %v528_v19 }
 0x409   :  { %v539_v26 = vrot.slane %v536_v24, 4 }
 0x40b   :  { %v540_v27 = vsel %vm72_vm0, %v535_v25, %v539_v26 }
 0x40c   :  { %541 = vrot.lane.b32.xlu1 %v540_v27, %s2223_s17 }
 0x47e   :  { %v542_v41 = vpop.permute.xlu1 %541 }
 0x47f   :  { %v543_v44 = vrot.slane %v542_v41, 4 }
 0x481   :  { %v544_v47 = vsel %vm485_vm4, %v543_v44, %v542_v41  ;;  %v548_v51 = vmul.f32 %v543_v44, %v534_v33 }
 0x482   :  { %v547_v52 = vmul.f32 %v544_v47, %v533_v40 }
 0x483   :  { %553 = vst [vmem:[#allocation1 + $0x10] ss:$2 sm:$0xff] %v548_v51 }
 0x484   :  { %551 = vst [vmem:[#allocation1] ss:$2 sm:$0xff] %v547_v52 }
 0x48a   :  { %v556_v54 = vld.sshfl [vmem:[#allocation1 + $0x10] sm:$0xff pattern:$0x75316420] }
 0x48b   :  { %v2426_v55 = vld.sshfl [vmem:[#allocation1] sm:$0xff pattern:$0x75316420]  ;;  %v2428_v56 = vld.sshfl [vmem:[#allocation1 + $0x8] sm:$0xff pattern:$0x75316420]  ;;  %v561_v6 = vpack.c.bf16 %v556_v54, %v556_v54 }
 0x48c   :  { %579 = vst [vmem:[#allocation1] ss:$9 sm:$0xff] %v577_v53 }
 0x48d   :  { %v565_v13 = vrot.slane %v561_v6, 6 }
 0x493   :  { %v580_v57 = vld [vmem:[#allocation1] sm:$0xff]  ;;  %v581_v58 = vld [vmem:[#allocation1 + $0x9] sm:$0xff] }
 0x494   :  { %v582_v59 = vpack.i.b16 %v580_v57, %v580_v57  ;;  %v585_v60 = vpack.i.b16 %v581_v58, %v581_v58  ;;  %v1923_v57 = vld [vmem:[%s2930_s0 + $0x6] sm:$0x3f] }
 0x495   :  { %v644_v58 = vunpack.c.h.bf16 %v1923_v57 }
 0x496   :  { %v584_v61 = vperm.slane %v582_v59, 0  ;;  %v587_v62 = vperm.slane %v585_v60, 0  ;;  %v643_v59 = vunpack.c.l.bf16 %v1923_v57 }
 0x498   :  { %v591_v63 = vunpack.c.l.bf16 %v587_v62  ;;  %v590_v3 = vunpack.c.l.bf16 %v584_v61 }
 0x49a   :  { %v594_v4 = vrot.slane %v591_v63, 4 }
 0x49c   :  { %v595_v5 = vsel %vm72_vm0, %v590_v3, %v594_v4  ;;  %v684_v4 = vld [vmem:[%s2930_s0] sm:$0x3f] }
 0x49d   :  { %596 = vrot.lane.b32.xlu2 %v595_v5, %s2224_s27 }
 0x4a5   :  { %450 = vrot.lane.b32.xlu2 %v2398_v38, %s2225_s28  ;;  %v632_v38 = vld [vmem:[%s2935_s5] sm:$0x3] }
 0x4ad   :  { %568 = vrot.lane.b32.xlu2 %v565_v13, %s2226_s30  ;;  %v1924_v13 = vld [vmem:[%s2930_s0 + $0x6] sm:$0x3f] }
 0x4f7   :  { %v597_v17 = vpop.permute.xlu2 %596 }
 0x4f8   :  { %v598_v18 = vrot.slane %v597_v17, 4 }
 0x4fa   :  { %v600_v19 = vsel %vm599_vm5, %v598_v18, %v597_v17  ;;  %v604_v23 = vmul.f32 %v598_v18, %v589_v15 }
 0x4fb   :  { %v603_v24 = vmul.f32 %v600_v19, %v588_v16  ;;  %v722_v16 = vld [vmem:[%s2935_s5] sm:$0x3] }
 0x4fc   :  { %609 = vst [vmem:[#allocation1 + $0x10] ss:$2 sm:$0xff] %v604_v23 }
 0x4fd   :  { %607 = vst [vmem:[#allocation1] ss:$2 sm:$0xff] %v603_v24 }
 0x4ff   :  { %v451_v57 = vpop.permute.xlu2 %450 }
 0x503   :  { %v2442_v25 = vld.sshfl [vmem:[#allocation1 + $0x10] sm:$0xff pattern:$0x75316420] }
 0x504   :  { %v2444_v26 = vld.sshfl [vmem:[#allocation1] sm:$0xff pattern:$0x75316420]  ;;  %v2446_v27 = vld.sshfl [vmem:[#allocation1 + $0x8] sm:$0xff pattern:$0x75316420] }
 0x505   :  { %634 = vst [vmem:[#allocation1] ss:$9 sm:$0xff] %v632_v38 }
 0x50c   :  { %v635_v30 = vld [vmem:[#allocation1] sm:$0xff]  ;;  %v636_v33 = vld [vmem:[#allocation1 + $0x9] sm:$0xff] }
 0x50d   :  { %v637_v40 = vpack.i.b16 %v635_v30, %v635_v30  ;;  %v640_v41 = vpack.i.b16 %v636_v33, %v636_v33 }
 0x50f   :  { %v639_v44 = vperm.slane %v637_v40, 0  ;;  %v642_v47 = vperm.slane %v640_v41, 0 }
 0x511   :  { %v646_v51 = vunpack.c.l.bf16 %v642_v47  ;;  %v645_v52 = vunpack.c.l.bf16 %v639_v44  ;;  %v300_v47 = vpack.c.bf16 %v2352_v35, %v2352_v35 }
 0x513   :  { %v649_v53 = vrot.slane %v646_v51, 4 }
 0x515   :  { %v650_v54 = vsel %vm72_vm0, %v645_v52, %v649_v53 }
 0x516   :  { %651 = vrot.lane.b32.xlu0 %v650_v54, %s2224_s27 }
 0x51e   :  { %452 = vrot.lane.b32.xlu0 %v2400_v39, %s2225_s28 }
 0x588   :  { %v652_v60 = vpop.permute.xlu0 %651 }
 0x589   :  { %v653_v61 = vrot.slane %v652_v60, 4 }
 0x58b   :  { %v654_v62 = vsel %vm599_vm5, %v653_v61, %v652_v60  ;;  %v658_v63 = vmul.f32 %v653_v61, %v644_v58 }
 0x58c   :  { %v657_v3 = vmul.f32 %v654_v62, %v643_v59  ;;  %v454_v59 = vrot.slane %v451_v57, 4 }
 0x58d   :  { %663 = vst [vmem:[#allocation1 + $0x10] ss:$2 sm:$0xff] %v658_v63 }
 0x58e   :  { %661 = vst [vmem:[#allocation1] ss:$2 sm:$0xff] %v657_v3  ;;  %v150_v3 = vpack.c.bf16 %v2310_v43, %v2308_v42 }
 0x590   :  { %v453_v35 = vpop.permute.xlu0 %452 }
 0x591   :  { %v455_v60 = vrot.slane %v453_v35, 4 }
 0x593   :  { %v456_v61 = vsel %vm72_vm0, %v454_v59, %v455_v60 }
 0x594   :  { %v666_v17 = vld.sshfl [vmem:[#allocation1 + $0x10] sm:$0xff pattern:$0x75316420]  ;;  %v457_v62 = vsel %vm439_vm6, %v451_v57, %v456_v61 }
 0x595   :  { %v664_v5 = vld.sshfl [vmem:[#allocation1] sm:$0xff pattern:$0x75316420]  ;;  %v665_v39 = vld.sshfl [vmem:[#allocation1 + $0x8] sm:$0xff pattern:$0x75316420]  ;;  %v671_v63 = vpack.c.bf16 %v666_v17, %v666_v17 }
 0x596   :  { %v670_v6 = vpack.c.bf16 %v665_v39, %v664_v5  ;;  %687 = vst [vmem:[#allocation1 + $0x1] ss:$2 sm:$0xff] %v684_v4  ;;  %v721_v4 = vld [vmem:[%s2930_s0] sm:$0x3f] }
 0x597   :  { %459 = vst [vmem:[#allocation3 + $0x28] sm:$0x33] %v457_v62  ;;  %v736_v5 = vunpack.c.h.bf16 %v721_v4  ;;  %v735_v39 = vunpack.c.l.bf16 %v721_v4 }
 0x598   :  { %674 = vrot.lane.b32.xlu0 %v670_v6, %s2227_s14 }
 0x59d   :  { %v2463_v14 = vld.sshfl [vmem:[#allocation1] sm:$0xff pattern:$0x75643120]  ;;  %v2465_v15 = vld.sshfl [vmem:[#allocation1 + $0x8] sm:$0xff pattern:$0x75643120] }
 0x59e   :  { %706 = vst [vmem:[#allocation1 + $0x1] ss:$2 sm:$0xff] %v1924_v13 }
 0x5a5   :  { %v709_v18 = vld.sshfl [vmem:[#allocation1 + $0x8] sm:$0xff pattern:$0x75643120]  ;;  %v2470_v19 = vld.sshfl [vmem:[#allocation1] sm:$0xff pattern:$0x75643120] }
 0x5a6   :  { %713 = vrot.lane.b32.xlu0 %v709_v18, %s2228_s21  ;;  %724 = vst [vmem:[#allocation1] ss:$9 sm:$0xff] %v722_v16  ;;  %v569_v16 = vpop.permute.xlu2 %568 }
 0x5ad   :  { %v725_v23 = vld [vmem:[#allocation1] sm:$0xff]  ;;  %v726_v24 = vld [vmem:[#allocation1 + $0x9] sm:$0xff] }
 0x5ae   :  { %191 = vrot.lane.b32.xlu0 %v2324_v49, %s2229_s22  ;;  %v727_v38 = vshrl.u32 %v725_v23, 16  ;;  %v731_v30 = vshrl.u32 %v726_v24, 16  ;;  %v560_v49 = vpack.c.bf16 %v2428_v56, %v2426_v55  ;;  %v409_v55 = vpack.c.bf16 %v2384_v29, %v2382_v28 }
 0x5af   :  { %v571_v29 = vrot.slane %v569_v16, 4  ;;  %v410_v16 = vpack.c.bf16 %v2396_v34, %v2396_v34 }
 0x5b0   :  { %v728_v33 = vpack.i.b16 %v727_v38, %v727_v38  ;;  %v732_v40 = vpack.i.b16 %v731_v30, %v731_v30  ;;  %v564_v58 = vrot.slane %v560_v49, 6  ;;  %v413_v56 = vrot.slane %v409_v55, 6  ;;  %v779_v30 = vld [vmem:[%s2935_s5] sm:$0x3] }
 0x5b1   :  { %v617_v55 = vpack.c.bf16 %v2442_v25, %v2442_v25 }
 0x5b2   :  { %v730_v41 = vperm.slane %v728_v33, 0  ;;  %v734_v44 = vperm.slane %v732_v40, 0 }
 0x5b4   :  { %v738_v51 = vunpack.c.l.bf16 %v734_v44  ;;  %v737_v52 = vunpack.c.l.bf16 %v730_v41 }
 0x5b6   :  { %305 = vrot.lane.b32.xlu0 %v300_v47, %s2230_s23  ;;  %v741_v53 = vrot.slane %v738_v51, 4 }
 0x5b8   :  { %v742_v54 = vsel %vm72_vm0, %v737_v52, %v741_v53  ;;  %v502_v53 = vpack.c.bf16 %v2415_v12, %v2413_v11 }
 0x5b9   :  { %743 = vrot.lane.b32.xlu1 %v742_v54, %s2231_s24 }
 0x5c1   :  { %566 = vrot.lane.b32.xlu1 %v564_v58, %s2226_s30  ;;  %v506_v58 = vrot.slane %v502_v53, 6 }
 0x5c9   :  { %676 = vrot.lane.b32.xlu1 %v671_v63, %s2227_s14 }
 0x5d1   :  { %154 = vrot.lane.b32.xlu1 %v150_v3, %s2232_s25 }
 0x5d9   :  { %193 = vrot.lane.b32.xlu1 %v2326_v50, %s2229_s22 }
 0x5e1   :  { %415 = vrot.lane.b32.xlu1 %v413_v56, %s2233_s26 }
 0x60a   :  { %v675_v23 = vpop.permute.xlu0 %674 }
 0x60b   :  { %v678_v51 = vrot.slane %v675_v23, 4 }
 0x618   :  { %v2508_v49 = vpop.permute.xlu0 %713 }
 0x620   :  { %v192_v4 = vpop.permute.xlu0 %191 }
 0x62b   :  { %v744_v42 = vpop.permute.xlu1 %743 }
 0x62c   :  { %v745_v43 = vrot.slane %v744_v42, 4 }
 0x62e   :  { %v747_v6 = vsel %vm746_vm7, %v745_v43, %v744_v42  ;;  %v751_v13 = vmul.f32 %v745_v43, %v736_v5  ;;  %v616_v5 = vpack.c.bf16 %v2446_v27, %v2444_v26  ;;  %v151_v26 = vpack.c.bf16 %v2322_v48, %v2322_v48 }
 0x62f   :  { %v750_v50 = vmul.f32 %v747_v6, %v735_v39  ;;  %v195_v6 = vrot.slane %v192_v4, 4  ;;  %v299_v27 = vpack.c.bf16 %v2356_v37, %v2354_v36  ;;  %v95_v36 = vpack.c.bf16 %v2293_v20, %v2293_v20  ;;  %v2558_v20 = vpop.permute.xlu0 %305 }
 0x630   :  { %756 = vst [vmem:[#allocation1 + $0x10] ss:$2 sm:$0xff] %v751_v13  ;;  %v243_v37 = vpack.c.bf16 %v2341_v10, %v2339_v9 }
 0x631   :  { %754 = vst [vmem:[#allocation1] ss:$2 sm:$0xff] %v750_v50 }
 0x633   :  { %v567_v28 = vpop.permute.xlu1 %566 }
 0x634   :  { %v570_v17 = vrot.slane %v567_v28, 4 }
 0x636   :  { %v572_v18 = vsel %vm72_vm0, %v570_v17, %v571_v29 }
 0x637   :  { %v573_v24 = vsel %vm515_vm8, %v567_v28, %v572_v18  ;;  %v759_v38 = vld.sshfl [vmem:[#allocation1 + $0x10] sm:$0xff pattern:$0x75316420]  ;;  %v414_v28 = vrot.slane %v410_v16, 6 }
 0x638   :  { %575 = vst [vmem:[#allocation3 + $0x28] sm:$0xcc] %v573_v24  ;;  %v764_v33 = vpack.c.bf16 %v759_v38, %v759_v38  ;;  %v757_v40 = vld.sshfl [vmem:[#allocation1] sm:$0xff pattern:$0x75316420] }
 0x639   :  { %v758_v41 = vld.sshfl [vmem:[#allocation1 + $0x8] sm:$0xff pattern:$0x75316420] }
 0x63a   :  { %769 = vrot.lane.b32.xlu1 %v764_v33, %s2234_s10  ;;  %v763_v44 = vpack.c.bf16 %v758_v41, %v757_v40  ;;  %781 = vst [vmem:[#allocation1] ss:$9 sm:$0xff] %v779_v30  ;;  %v716_v41 = vrot.slane %v2508_v49, 4 }
 0x63b   :  { %v677_v47 = vpop.permute.xlu1 %676 }
 0x63c   :  { %767 = vrot.lane.b32.xlu0 %v763_v44, %s2234_s10  ;;  %v679_v52 = vrot.slane %v677_v47, 4 }
 0x63e   :  { %v680_v54 = vsel %vm72_vm0, %v678_v51, %v679_v52  ;;  %v1006_v51 = vld [vmem:[%s2935_s5] sm:$0x3] }
 0x63f   :  { %v681_v57 = vsel %vm2937_vm9, %v675_v23, %v680_v54 }
 0x640   :  { %683 = vst [vmem:[#allocation3 + $0x38] sm:$0x33] %v681_v57 }
 0x641   :  { %v782_v59 = vld [vmem:[#allocation1] sm:$0xff]  ;;  %v783_v35 = vld [vmem:[#allocation1 + $0x9] sm:$0xff] }
 0x642   :  { %508 = vrot.lane.b32.xlu1 %v506_v58, %s2226_s30  ;;  %v784_v60 = vshrl.u32 %v782_v59, 16  ;;  %v788_v61 = vshrl.u32 %v783_v35, 16 }
 0x643   :  { %v2512_v62 = vpop.permute.xlu1 %154 }
 0x644   :  { %434 = vrot.lane.b32.xlu0 %v2391_v32, %s2225_s28  ;;  %v785_v11 = vpack.i.b16 %v784_v60, %v784_v60  ;;  %v789_v12 = vpack.i.b16 %v788_v61, %v788_v61 }
 0x646   :  { %v787_v63 = vperm.slane %v785_v11, 0  ;;  %v791_v3 = vperm.slane %v789_v12, 0  ;;  %v2235_v11 = vmov 0  }
 0x647   :  { %2077 = vset.pattern.permute.xlu0 %v2235_v11  ;;  %2138 = vset.pattern.permute.xlu1 %v2235_v11 }
 0x648   :  { %v795_v56 = vunpack.c.l.bf16 %v791_v3  ;;  %v794_v39 = vunpack.c.l.bf16 %v787_v63  ;;  %v158_v63 = vrot.slane %v2512_v62, 4  ;;  %2139 = vset.pattern.permute.xlu2 %v2235_v11 }
 0x64a   :  { %622 = vrot.lane.b32.xlu1 %v617_v55, %s2227_s14  ;;  %v798_v42 = vrot.slane %v795_v56, 4  ;;  %v1051_v55 = vld [vmem:[%s2935_s5] sm:$0x3] }
 0x64b   :  { %v194_v43 = vpop.permute.xlu1 %193 }
 0x64c   :  { %620 = vrot.lane.b32.xlu0 %v616_v5, %s2227_s14  ;;  %v196_v32 = vrot.slane %v194_v43, 4  ;;  %v799_v13 = vsel %vm72_vm0, %v794_v39, %v798_v42 }
 0x64d   :  { %800 = vrot.lane.b32.xlu2 %v799_v13, %s2231_s24  ;;  %v94_v13 = vpack.c.bf16 %v2297_v22, %v2295_v21  ;;  %v308_v21 = vrot.slane %v2558_v20, 4 }
 0x64e   :  { %v197_v25 = vsel %vm72_vm0, %v195_v6, %v196_v32 }
 0x64f   :  { %v198_v50 = vsel %vm2940_vm10, %v192_v4, %v197_v25 }
 0x650   :  { %200 = vst [vmem:[#allocation3 + $0x8] sm:$0xcc] %v198_v50 }
 0x655   :  { %711 = vrot.lane.b32.xlu2 %v2470_v19, %s2228_s21  ;;  %v503_v19 = vpack.c.bf16 %v2411_v7, %v2411_v7  ;;  %v1925_v7 = vld [vmem:[%s2930_s0 + $0x6] sm:$0x3f] }
 0x656   :  { %v793_v29 = vunpack.c.h.bf16 %v1925_v7  ;;  %v792_v17 = vunpack.c.l.bf16 %v1925_v7 }
 0x657   :  { %v507_v48 = vrot.slane %v503_v19, 6 }
 0x65d   :  { %156 = vrot.lane.b32.xlu2 %v151_v26, %s2232_s25 }
 0x665   :  { %303 = vrot.lane.b32.xlu2 %v299_v27, %s2230_s23 }
 0x66d   :  { %417 = vrot.lane.b32.xlu2 %v414_v28, %s2233_s26 }
 0x675   :  { %432 = vrot.lane.b32.xlu2 %v2389_v31, %s2225_s28  ;;  %v354_v31 = vpack.c.bf16 %v2367_v0, %v2367_v0 }
 0x677   :  { %v358_v34 = vrot.slane %v354_v31, 6 }
 0x67d   :  { %510 = vrot.lane.b32.xlu2 %v507_v48, %s2226_s30 }
 0x685   :  { %692 = vrot.lane.b32.xlu2 %v2463_v14, %s2228_s21  ;;  %v2556_v14 = vpop.permute.xlu1 %415 }
 0x68d   :  { %100 = vrot.lane.b32.xlu2 %v95_v36, %s2232_s25  ;;  %v1124_v36 = vld [vmem:[%s2935_s5] sm:$0x3] }
 0x695   :  { %247 = vrot.lane.b32.xlu2 %v243_v37, %s2230_s23 }
 0x69d   :  { %361 = vrot.lane.b32.xlu2 %v358_v34, %s2233_s26 }
 0x6a7   :  { %v801_v18 = vpop.permute.xlu2 %800 }
 0x6a8   :  { %v802_v9 = vrot.slane %v801_v18, 4 }
 0x6aa   :  { %v803_v10 = vsel %vm746_vm7, %v802_v9, %v801_v18  ;;  %v807_v23 = vmul.f32 %v802_v9, %v793_v29  ;;  %v419_v29 = vrot.slane %v2556_v14, 4  ;;  %v353_v18 = vpack.c.bf16 %v2371_v2, %v2369_v1  ;;  %v1171_v9 = vld [vmem:[%s2935_s5] sm:$0x3] }
 0x6ab   :  { %v806_v24 = vmul.f32 %v803_v10, %v792_v17 }
 0x6ac   :  { %812 = vst [vmem:[#allocation1 + $0x10] ss:$2 sm:$0xff] %v807_v23  ;;  %v770_v0 = vpop.permute.xlu1 %769 }
 0x6ad   :  { %810 = vst [vmem:[#allocation1] ss:$2 sm:$0xff] %v806_v24  ;;  %v772_v38 = vrot.slane %v770_v0, 4  ;;  %v244_v0 = vpack.c.bf16 %v2337_v8, %v2337_v8 }
 0x6ae   :  { %v768_v30 = vpop.permute.xlu0 %767 }
 0x6af   :  { %v771_v33 = vrot.slane %v768_v30, 4  ;;  %v712_v40 = vpop.permute.xlu2 %711 }
 0x6b0   :  { %v715_v44 = vrot.slane %v712_v40, 4 }
 0x6b1   :  { %v773_v47 = vsel %vm72_vm0, %v771_v33, %v772_v38 }
 0x6b2   :  { %v775_v52 = vsel %vm774_vm11, %v768_v30, %v773_v47  ;;  %v717_v53 = vsel %vm72_vm0, %v715_v44, %v716_v41 }
 0x6b3   :  { %v815_v54 = vld.sshfl [vmem:[#allocation1 + $0x10] sm:$0xff pattern:$0x75316420]  ;;  %777 = vst [vmem:[#allocation3 + $0x40] sm:$0x33] %v775_v52  ;;  %v718_v57 = vsel %vm699_vm12, %v712_v40, %v717_v53 }
 0x6b4   :  { %v813_v58 = vld.sshfl [vmem:[#allocation1] sm:$0xff pattern:$0x75316420]  ;;  %v814_v59 = vld.sshfl [vmem:[#allocation1 + $0x8] sm:$0xff pattern:$0x75316420]  ;;  %v2569_v35 = vpop.permute.xlu1 %508  ;;  %v820_v49 = vpack.c.bf16 %v815_v54, %v815_v54 }
 0x6b5   :  { %1008 = vst [vmem:[#allocation1] ss:$9 sm:$0xff] %v1006_v51  ;;  %v819_v60 = vpack.c.bf16 %v814_v59, %v813_v58  ;;  %v1218_v52 = vld [vmem:[%s2935_s5] sm:$0x3] }
 0x6b6   :  { %720 = vst [vmem:[#allocation3 + $0x38] sm:$0xcc] %v718_v57  ;;  %v2571_v61 = vpop.permute.xlu0 %434  ;;  %825 = vrot.lane.b32.xlu1 %v820_v49, %s2234_s10  ;;  %v844_v49 = vld [vmem:[%s2932_s2] sm:$0xff] }
 0x6b7   :  { %823 = vrot.lane.b32.xlu0 %v819_v60, %s2234_s10  ;;  %v157_v12 = vpop.permute.xlu2 %156  ;;  %v437_v2 = vrot.slane %v2571_v61, 4 }
 0x6b8   :  { %v159_v3 = vrot.slane %v157_v12, 4 }
 0x6ba   :  { %v160_v56 = vsel %vm72_vm0, %v158_v63, %v159_v3  ;;  %v842_v4 = vld [vmem:[#allocation3 + $0x40] sm:$0x33]  ;;  %v512_v63 = vrot.slane %v2569_v35, 4 }
 0x6bb   :  { %v876_v5 = vunpack.c.l.b16 %v842_v4  ;;  %v877_v39 = vunpack.c.h.b16 %v842_v4  ;;  %v161_v42 = vsel %vm2938_vm13, %v2512_v62, %v160_v56 }
 0x6bc   :  { %v2585_v43 = vld [vmem:[#allocation1] sm:$0xff]  ;;  %v2587_v6 = vld [vmem:[#allocation1 + $0x9] sm:$0xff]  ;;  %v623_v32 = vpop.permute.xlu1 %622  ;;  %163 = vst [vmem:[#allocation3 + $0x8] sm:$0x33] %v161_v42 }
 0x6bd   :  { %1053 = vst [vmem:[#allocation1] ss:$9 sm:$0xff] %v1051_v55  ;;  %v625_v25 = vrot.slane %v623_v32, 4  ;;  %v888_v50 = vpack.c.b16 %v876_v5, %v876_v5  ;;  %v889_v26 = vpack.c.b16 %v877_v39, %v877_v39  ;;  %v1014_v44 = vpack.i.b16 %v2587_v6, %v2587_v6 }
 0x6be   :  { %v621_v27 = vpop.permute.xlu0 %620  ;;  %98 = vrot.lane.b32.xlu1 %v94_v13, %s2232_s25 }
 0x6bf   :  { %v624_v16 = vrot.slane %v621_v27, 4  ;;  %694 = vrot.lane.b32.xlu0 %v2465_v15, %s2228_s21  ;;  %v304_v62 = vpop.permute.xlu2 %303  ;;  %v906_v28 = vsel %vm904_vm14, %v888_v50, 0  ;;  %v909_v19 = vsel %vm904_vm14, %v889_v26, 0  ;;  %v1016_v60 = vperm.slane %v1014_v44, 0 }
 0x6c0   :  { %v307_v22 = vrot.slane %v304_v62, 4  ;;  %922 = vmatpush.bf16.msra.mxu0 %v906_v28  ;;  %935 = vmatpush.bf16.msra.mxu1 %v909_v19 }
 0x6c1   :  { %v626_v48 = vsel %vm72_vm0, %v624_v16, %v625_v25  ;;  %v1021_v4 = vunpack.c.l.bf16 %v1016_v60 }
 0x6c2   :  { %v628_v37 = vsel %vm2937_vm9, %v621_v27, %v626_v48  ;;  %v309_v15 = vsel %vm72_vm0, %v307_v22, %v308_v21  ;;  %vm2939_vm9 = vcmask 793600  }
 0x6c3   :  { %630 = vst [vmem:[#allocation3 + $0x30] sm:$0x33] %v628_v37  ;;  %v310_v31 = vsel %vm2941_vm15, %v304_v62, %v309_v15 }
 0x6c4   :  { %v1054_v34 = vld [vmem:[#allocation1] sm:$0xff]  ;;  %v1055_v7 = vld [vmem:[#allocation1 + $0x9] sm:$0xff]  ;;  %312 = vst [vmem:[#allocation3 + $0x18] sm:$0x33] %v310_v31 }
 0x6c5   :  { %1126 = vst [vmem:[#allocation1] ss:$9 sm:$0xff] %v1124_v36  ;;  %v1056_v5 = vpack.i.b16 %v1054_v34, %v1054_v34  ;;  %v1059_v39 = vpack.i.b16 %v1055_v7, %v1055_v7  ;;  %v1336_v31 = vld [vmem:[%s2935_s5] sm:$0x3] }
 0x6c6   :  { %174 = vrot.lane.b32.xlu1 %v2317_v46, %s2229_s22 }
 0x6c7   :  { %172 = vrot.lane.b32.xlu0 %v2315_v45, %s2229_s22  ;;  %v418_v20 = vpop.permute.xlu2 %417  ;;  %v357_v45 = vrot.slane %v353_v18, 6  ;;  %v1058_v50 = vperm.slane %v1056_v5, 0  ;;  %v1061_v26 = vperm.slane %v1059_v39, 0 }
 0x6c8   :  { %v420_v17 = vrot.slane %v418_v20, 4 }
 0x6c9   :  { %v1065_v22 = vunpack.c.l.bf16 %v1058_v50  ;;  %v1066_v48 = vunpack.c.l.bf16 %v1061_v26  ;;  %v1548_v26 = vld [vmem:[%s2935_s5] sm:$0x3] }
 0x6ca   :  { %v421_v10 = vsel %vm72_vm0, %v419_v29, %v420_v17 }
 0x6cb   :  { %v422_v46 = vsel %vm2939_vm9, %v2556_v14, %v421_v10  ;;  %v1011_v14 = vpack.i.b16 %v2585_v43, %v2585_v43  ;;  %v1263_v43 = vld [vmem:[%s2935_s5] sm:$0x3]  ;;  %v2083_v7 = vpack.i.bf16 %v1066_v48, %v1065_v22 }
 0x6cc   :  { %v1127_v23 = vld [vmem:[#allocation1] sm:$0xff]  ;;  %v1128_v24 = vld [vmem:[#allocation1 + $0x9] sm:$0xff]  ;;  %424 = vst [vmem:[#allocation3 + $0x18] sm:$0xcc] %v422_v46 }
 0x6cd   :  { %1173 = vst [vmem:[#allocation1] ss:$9 sm:$0xff] %v1171_v9  ;;  %v1129_v38 = vshrl.u32 %v1127_v23, 16  ;;  %v1133_v1 = vshrl.u32 %v1128_v24, 16  ;;  %v1013_v58 = vperm.slane %v1011_v14, 0 }
 0x6ce   :  { %359 = vrot.lane.b32.xlu1 %v357_v45, %s2233_s26 }
 0x6cf   :  { %249 = vrot.lane.b32.xlu0 %v244_v0, %s2230_s23  ;;  %v433_v30 = vpop.permute.xlu2 %432  ;;  %v1130_v33 = vpack.i.b16 %v1129_v38, %v1129_v38  ;;  %v1134_v40 = vpack.i.b16 %v1133_v1, %v1133_v1  ;;  %v1020_v55 = vunpack.c.l.bf16 %v1013_v58  ;;  %v1383_v1 = vld [vmem:[%s2935_s5] sm:$0x3] }
 0x6d0   :  { %v436_v41 = vrot.slane %v433_v30, 4 }
 0x6d1   :  { %v1132_v47 = vperm.slane %v1130_v33, 0  ;;  %v1136_v8 = vperm.slane %v1134_v40, 0  ;;  %v2078_v32 = vpack.i.bf16 %v1021_v4, %v1020_v55  ;;  %v1475_v55 = vld [vmem:[%s2935_s5] sm:$0x3] }
 0x6d2   :  { %v438_v51 = vsel %vm72_vm0, %v436_v41, %v437_v2 }
 0x6d3   :  { %v440_v53 = vsel %vm439_vm6, %v433_v30, %v438_v51  ;;  %v1140_v54 = vunpack.c.l.bf16 %v1132_v47  ;;  %v1141_v57 = vunpack.c.l.bf16 %v1136_v8 }
 0x6d4   :  { %v1175_v59 = vld [vmem:[#allocation1 + $0x9] sm:$0xff]  ;;  %442 = vst [vmem:[#allocation3 + $0x20] sm:$0x33] %v440_v53  ;;  %v1174_v61 = vld [vmem:[#allocation1] sm:$0xff] }
 0x6d5   :  { %v2088_v12 = vpack.i.bf16 %v1141_v57, %v1140_v54  ;;  %1220 = vst [vmem:[#allocation1] ss:$9 sm:$0xff] %v1218_v52  ;;  %v1176_v62 = vshrl.u32 %v1174_v61, 16  ;;  %v1180_v28 = vshrl.u32 %v1175_v59, 16  ;;  %v1430_v52 = vld [vmem:[%s2935_s5] sm:$0x3] }
 0x6d7   :  { %847 = vperm.xlu0 %2077, %v844_v49   ;;  %v511_v3 = vpop.permute.xlu2 %510  ;;  %2089 = vrot.lane.b32.xlu1 %v2088_v12, %s2221_s20  ;;  %v1181_v15 = vpack.i.b16 %v1180_v28, %v1180_v28 }
 0x6d8   :  { %v513_v56 = vrot.slane %v511_v3, 4 }
 0x6d9   :  { %v1183_v10 = vperm.slane %v1181_v15, 0 }
 0x6da   :  { %v514_v42 = vsel %vm72_vm0, %v512_v63, %v513_v56 }
 0x6db   :  { %v516_v6 = vsel %vm515_vm8, %v2569_v35, %v514_v42  ;;  %v1177_v35 = vpack.i.b16 %v1176_v62, %v1176_v62  ;;  %v1188_v38 = vunpack.c.l.bf16 %v1183_v10 }
 0x6dc   :  { %518 = vst [vmem:[#allocation3 + $0x20] sm:$0xcc] %v516_v6  ;;  %v1221_v13 = vld [vmem:[#allocation1] sm:$0xff]  ;;  %v1222_v25 = vld [vmem:[#allocation1 + $0x9] sm:$0xff] }
 0x6dd   :  { %v1223_v27 = vpack.i.b16 %v1221_v13, %v1221_v13  ;;  %v1226_v16 = vpack.i.b16 %v1222_v25, %v1222_v25  ;;  %1265 = vst [vmem:[#allocation1] ss:$9 sm:$0xff] %v1263_v43  ;;  %v1179_v9 = vperm.slane %v1177_v35, 0 }
 0x6df   :  { %2079 = vrot.lane.b32.xlu0 %v2078_v32, %s2220_s3  ;;  %v1225_v19 = vperm.slane %v1223_v27, 0  ;;  %v1228_v21 = vperm.slane %v1226_v16, 0  ;;  %v1187_v0 = vunpack.c.l.bf16 %v1179_v9 }
 0x6e1   :  { %v1232_v36 = vunpack.c.l.bf16 %v1225_v19  ;;  %v1233_v37 = vunpack.c.l.bf16 %v1228_v21  ;;  %v2093_v40 = vpack.i.bf16 %v1188_v38, %v1187_v0 }
 0x6e3   :  { %v2098_v34 = vpack.i.bf16 %v1233_v37, %v1232_v36  ;;  %v1595_v37 = vld [vmem:[%s2935_s5] sm:$0x3]  ;;  %s2236_s5 = smov 32  }
 0x6e4   :  { %v1266_v20 = vld [vmem:[#allocation1] sm:$0xff]  ;;  %v1267_v29 = vld [vmem:[#allocation1 + $0x9] sm:$0xff] }
 0x6e5   :  { %2099 = vrot.lane.b32.xlu2 %v2098_v34, %s2222_s29  ;;  %v1268_v17 = vpack.i.b16 %v1266_v20, %v1266_v20  ;;  %v1271_v18 = vpack.i.b16 %v1267_v29, %v1267_v29  ;;  %1338 = vst [vmem:[#allocation1] ss:$9 sm:$0xff] %v1336_v31 }
 0x6e7   :  { %2084 = vrot.lane.b32.xlu0 %v2083_v7, %s2220_s3  ;;  %v1270_v46 = vperm.slane %v1268_v17, 0  ;;  %v1273_v23 = vperm.slane %v1271_v18, 0 }
 0x6e9   :  { %v1277_v24 = vunpack.c.l.bf16 %v1270_v46  ;;  %v1278_v45 = vunpack.c.l.bf16 %v1273_v23 }
 0x6eb   :  { %v2103_v2 = vpack.i.bf16 %v1278_v45, %v1277_v24 }
 0x6ec   :  { %v1339_v30 = vld [vmem:[#allocation1] sm:$0xff]  ;;  %v1340_v33 = vld [vmem:[#allocation1 + $0x9] sm:$0xff] }
 0x6ed   :  { %2104 = vrot.lane.b32.xlu1 %v2103_v2, %s2222_s29  ;;  %v1341_v14 = vshrl.u32 %v1339_v30, 16  ;;  %v1345_v41 = vshrl.u32 %v1340_v33, 16  ;;  %1385 = vst [vmem:[#allocation1] ss:$9 sm:$0xff] %v1383_v1 }
 0x6ef   :  { %2094 = vrot.lane.b32.xlu0 %v2093_v40, %s2221_s20  ;;  %v1342_v44 = vpack.i.b16 %v1341_v14, %v1341_v14  ;;  %v1346_v47 = vpack.i.b16 %v1345_v41, %v1345_v41  ;;  %v693_v41 = vpop.permute.xlu2 %692 }
 0x6f1   :  { %v1344_v8 = vperm.slane %v1342_v44, 0  ;;  %v1348_v51 = vperm.slane %v1346_v47, 0 }
 0x6f3   :  { %v1352_v53 = vunpack.c.l.bf16 %v1344_v8  ;;  %v1353_v54 = vunpack.c.l.bf16 %v1348_v51 }
 0x6f4   :  { %v1386_v57 = vld [vmem:[#allocation1] sm:$0xff]  ;;  %v1387_v58 = vld [vmem:[#allocation1 + $0x9] sm:$0xff] }
 0x6f5   :  { %v2108_v59 = vpack.i.bf16 %v1353_v54, %v1352_v53  ;;  %v1388_v49 = vshrl.u32 %v1386_v57, 16  ;;  %v1392_v60 = vshrl.u32 %v1387_v58, 16  ;;  %1432 = vst [vmem:[#allocation1] ss:$9 sm:$0xff] %v1430_v52 }
 0x6f7   :  { %2109 = vrot.lane.b32.xlu2 %v2108_v59, %s2223_s17  ;;  %v1389_v61 = vpack.i.b16 %v1388_v49, %v1388_v49  ;;  %v1393_v12 = vpack.i.b16 %v1392_v60, %v1392_v60  ;;  %v101_v51 = vpop.permute.xlu2 %100  ;;  %v696_v60 = vrot.slane %v693_v41, 4 }
 0x6f8   :  { %v103_v58 = vrot.slane %v101_v51, 4 }
 0x6f9   :  { %v1391_v63 = vperm.slane %v1389_v61, 0  ;;  %v1395_v3 = vperm.slane %v1393_v12, 0 }
 0x6fb   :  { %v1399_v56 = vunpack.c.l.bf16 %v1391_v63  ;;  %v1400_v4 = vunpack.c.l.bf16 %v1395_v3 }
 0x6fc   :  { %v1433_v5 = vld [vmem:[#allocation1] sm:$0xff]  ;;  %v1434_v39 = vld [vmem:[#allocation1 + $0x9] sm:$0xff] }
 0x6fd   :  { %v2113_v42 = vpack.i.bf16 %v1400_v4, %v1399_v56  ;;  %v1435_v43 = vpack.i.b16 %v1433_v5, %v1433_v5  ;;  %v1438_v6 = vpack.i.b16 %v1434_v39, %v1434_v39  ;;  %1477 = vst [vmem:[#allocation1] ss:$9 sm:$0xff] %v1475_v55 }
 0x6ff   :  { %2114 = vrot.lane.b32.xlu1 %v2113_v42, %s2223_s17  ;;  %v1437_v32 = vperm.slane %v1435_v43, 0  ;;  %v1440_v13 = vperm.slane %v1438_v6, 0  ;;  %v248_v63 = vpop.permute.xlu2 %247 }
 0x701   :  { %v1444_v25 = vunpack.c.l.bf16 %v1437_v32  ;;  %v1445_v50 = vunpack.c.l.bf16 %v1440_v13 }
 0x703   :  { %v2118_v27 = vpack.i.bf16 %v1445_v50, %v1444_v25  ;;  %v2038_v25 = vld [vmem:[#allocation3 + $0x34] sm:$0xf0] }
 0x704   :  { %v1478_v16 = vld [vmem:[#allocation1] sm:$0xff]  ;;  %v1479_v62 = vld [vmem:[#allocation1 + $0x9] sm:$0xff] }
 0x705   :  { %2119 = vrot.lane.b32.xlu2 %v2118_v27, %s2224_s27  ;;  %v1480_v28 = vpack.i.b16 %v1478_v16, %v1478_v16  ;;  %v1483_v19 = vpack.i.b16 %v1479_v62, %v1479_v62  ;;  %1550 = vst [vmem:[#allocation1] ss:$9 sm:$0xff] %v1548_v26  ;;  %v1954_v16 = vld [vmem:[#allocation3 + $0x38] sm:$0xf0] }
 0x707   :  { %v1482_v21 = vperm.slane %v1480_v28, 0  ;;  %v1485_v22 = vperm.slane %v1483_v19, 0  ;;  %v1952_v28 = vld [vmem:[#allocation3 + $0x28] sm:$0xf]  ;;  %v2036_v19 = vld [vmem:[#allocation3 + $0x2c] sm:$0xf] }
 0x709   :  { %v1489_v48 = vunpack.c.l.bf16 %v1482_v21  ;;  %v1490_v36 = vunpack.c.l.bf16 %v1485_v22  ;;  %v1944_v21 = vld [vmem:[#allocation3 + $0x20] sm:$0xf] }
 0x70b   :  { %v2123_v35 = vpack.i.bf16 %v1490_v36, %v1489_v48  ;;  %v1953_v48 = vor.u32 %v2038_v25, %v1952_v28  ;;  %v1957_v36 = vor.u32 %v2036_v19, %v1954_v16 }
 0x70c   :  { %v1551_v15 = vld [vmem:[#allocation1] sm:$0xff]  ;;  %v1552_v31 = vld [vmem:[#allocation1 + $0x9] sm:$0xff] }
 0x70d   :  { %2124 = vrot.lane.b32.xlu0 %v2123_v35, %s2224_s27  ;;  %v1553_v34 = vshrl.u32 %v1551_v15, 16  ;;  %v1557_v7 = vshrl.u32 %v1552_v31, 16  ;;  %1597 = vst [vmem:[#allocation1] ss:$9 sm:$0xff] %v1595_v37  ;;  %v2035_v35 = vld [vmem:[#allocation3 + $0x24] sm:$0xf]  ;;  %v362_v31 = vpop.permute.xlu2 %361 }
 0x70f   :  { %v1554_v20 = vpack.i.b16 %v1553_v34, %v1553_v34  ;;  %v1558_v29 = vpack.i.b16 %v1557_v7, %v1557_v7 }
 0x711   :  { %v1556_v17 = vperm.slane %v1554_v20, 0  ;;  %v1560_v18 = vperm.slane %v1558_v29, 0  ;;  %v2034_v20 = vld [vmem:[#allocation3 + $0x14] sm:$0xf0]  ;;  %v1938_v29 = vld [vmem:[#allocation3 + $0x18] sm:$0xf0] }
 0x713   :  { %v1564_v9 = vunpack.c.l.bf16 %v1556_v17  ;;  %v1565_v10 = vunpack.c.l.bf16 %v1560_v18  ;;  %v1936_v18 = vld [vmem:[#allocation3 + $0x8] sm:$0xf] }
 0x714   :  { %v1598_v46 = vld [vmem:[#allocation1] sm:$0xff]  ;;  %v1599_v23 = vld [vmem:[#allocation1 + $0x9] sm:$0xff] }
 0x715   :  { %v2128_v24 = vpack.i.bf16 %v1565_v10, %v1564_v9  ;;  %v1600_v45 = vshrl.u32 %v1598_v46, 16  ;;  %v1604_v0 = vshrl.u32 %v1599_v23, 16  ;;  %v2032_v9 = vld [vmem:[#allocation3 + $0xc] sm:$0xf]  ;;  %v364_v10 = vrot.slane %v362_v31, 4 }
 0x717   :  { %2129 = vrot.lane.b32.xlu2 %v2128_v24, %s2231_s24  ;;  %v1601_v38 = vpack.i.b16 %v1600_v45, %v1600_v45  ;;  %v1605_v1 = vpack.i.b16 %v1604_v0, %v1604_v0  ;;  %v1937_v24 = vor.u32 %v2034_v20, %v1936_v18  ;;  %v1941_v45 = vor.u32 %v2032_v9, %v1938_v29 }
 0x718   :  { %v251_v0 = vrot.slane %v248_v63, 4 }
 0x719   :  { %v1603_v2 = vperm.slane %v1601_v38, 0  ;;  %v1607_v30 = vperm.slane %v1605_v1, 0 }
 0x71b   :  { %v1611_v33 = vunpack.c.l.bf16 %v1603_v2  ;;  %v1612_v40 = vunpack.c.l.bf16 %v1607_v30  ;;  %v833_v2 = vld [vmem:[#allocation5] sm:$0xf] }
 0x71d   :  { %v2133_v14 = vpack.i.bf16 %v1612_v40, %v1611_v33 }
 0x71f   :  { %2134 = vrot.lane.b32.xlu1 %v2133_v14, %s2231_s24 }
 0x728   :  { %v826_v44 = vpop.permute.xlu1 %825 }
 0x729   :  { %v828_v47 = vrot.slane %v826_v44, 4  ;;  %v824_v8 = vpop.permute.xlu0 %823 }
 0x72a   :  { %v827_v52 = vrot.slane %v824_v8, 4 }
 0x72c   :  { %v829_v53 = vsel %vm72_vm0, %v827_v52, %v828_v47 }
 0x72d   :  { %v830_v54 = vsel %vm774_vm11, %v824_v8, %v829_v53 }
 0x72e   :  { %832 = vst [vmem:[#allocation3 + $0x48] sm:$0x33] %v830_v54 }
 0x730   :  { %v99_v57 = vpop.permute.xlu1 %98 }
 0x731   :  { %v102_v59 = vrot.slane %v99_v57, 4  ;;  %v695_v49 = vpop.permute.xlu0 %694 }
 0x732   :  { %v697_v61 = vrot.slane %v695_v49, 4 }
 0x733   :  { %v105_v12 = vsel %vm72_vm0, %v102_v59, %v103_v58 }
 0x734   :  { %v107_v3 = vsel %vm2938_vm13, %v99_v57, %v105_v12  ;;  %v698_v55 = vsel %vm72_vm0, %v696_v60, %v697_v61  ;;  %vm975_vm13 = vcmask 257024  }
 0x735   :  { %109 = vst [vmem:[#allocation3] sm:$0x33] %v107_v3  ;;  %v700_v56 = vsel %vm699_vm12, %v693_v41, %v698_v55  ;;  %v843_v4 = vld [vmem:[#allocation3 + $0x48] sm:$0x33] }
 0x736   :  { %702 = vst [vmem:[#allocation3 + $0x30] sm:$0xcc] %v700_v56  ;;  %v878_v5 = vunpack.c.l.b16 %v843_v4  ;;  %v879_v39 = vunpack.c.h.b16 %v843_v4 }
 0x737   :  { %976 = vst.msk [vmem:[#allocation2] sm:$0xf] %vm975_vm13, %v2235_v11 }
 0x738   :  { %v175_v42 = vpop.permute.xlu1 %174  ;;  %v890_v43 = vpack.c.b16 %v878_v5, %v878_v5  ;;  %v891_v6 = vpack.c.b16 %v879_v39, %v879_v39  ;;  %977 = vst.msk [vmem:[#allocation2 + $0xc] sm:$0xf] %vm975_vm13, %v2235_v11 }
 0x739   :  { %v177_v32 = vrot.slane %v175_v42, 4  ;;  %v173_v13 = vpop.permute.xlu0 %172 }
 0x73a   :  { %v176_v50 = vrot.slane %v173_v13, 4  ;;  %v912_v26 = vsel %vm904_vm14, %v890_v43, 0  ;;  %v915_v27 = vsel %vm904_vm14, %v891_v6, 0  ;;  %vm900_vm14 = vcmask 293888  }
 0x73b   :  { %948 = vmatpush.bf16.msra.mxu2 %v912_v26  ;;  %961 = vmatpush.bf16.msra.mxu3 %v915_v27 }
 0x73c   :  { %v178_v62 = vsel %vm72_vm0, %v176_v50, %v177_v32 }
 0x73d   :  { %v180_v22 = vsel %vm2940_vm10, %v173_v13, %v178_v62  ;;  %v2037_v37 = vld [vmem:[#allocation3 + $0x2c] sm:$0xf0]  ;;  %v1946_v15 = vld [vmem:[#allocation3 + $0x30] sm:$0xf0]  ;;  %vm985_vm10 = vcmask 261120  }
 0x73e   :  { %182 = vst [vmem:[#allocation3] sm:$0xcc] %v180_v22  ;;  %v1945_v34 = vor.u32 %v2037_v37, %v1944_v21  ;;  %v1949_v7 = vor.u32 %v2035_v35, %v1946_v15 }
 0x73f   :  { %949 = vmatpush.bf16.msra.mxu2 %v1953_v48  ;;  %962 = vmatpush.bf16.msra.mxu3 %v1957_v36  ;;  %v2698_v43 = vpop.permute.xlu2 %2099 }
 0x740   :  { %923 = vmatpush.bf16.msra.mxu0 %v1945_v34  ;;  %936 = vmatpush.bf16.msra.mxu1 %v1949_v7  ;;  %v360_v17 = vpop.permute.xlu1 %359  ;;  %v2102_v22 = vunpack.i.h.bf16 %v2698_v43  ;;  %v2101_v15 = vunpack.i.l.bf16 %v2698_v43 }
 0x741   :  { %v363_v46 = vrot.slane %v360_v17, 4  ;;  %v250_v23 = vpop.permute.xlu0 %249 }
 0x742   :  { %v252_v38 = vrot.slane %v250_v23, 4 }
 0x743   :  { %v365_v1 = vsel %vm72_vm0, %v363_v46, %v364_v10  ;;  %950 = vmatpush.bf16.msra.mxu2 %v1937_v24  ;;  %963 = vmatpush.bf16.msra.mxu3 %v1941_v45 }
 0x744   :  { %v367_v30 = vsel %vm2939_vm9, %v360_v17, %v365_v1  ;;  %v253_v33 = vsel %vm72_vm0, %v251_v0, %v252_v38  ;;  %vm978_vm9 = vcmask 519424   ;;  %v1240_v38 = vsel %vm336_vm3, %v2101_v15, %v2102_v22 }
 0x745   :  { %369 = vst [vmem:[#allocation3 + $0x10] sm:$0xcc] %v367_v30  ;;  %v255_v40 = vsel %vm2941_vm15, %v248_v63, %v253_v33  ;;  %v1928_v14 = vld [vmem:[#allocation3] sm:$0xf]  ;;  %v2031_v44 = vld [vmem:[#allocation3 + $0x4] sm:$0xf] }
 0x746   :  { %257 = vst [vmem:[#allocation3 + $0x10] sm:$0x33] %v255_v40  ;;  %1960 = vmatmul.msk.bf16.vlgmr.msra.gmra.mxu2 %vm900_vm14, %v833_v2  ;;  %1961 = vmatmul.msk.bf16.vlgmr.msra.gmra.mxu3 %vm900_vm14, %v833_v2 }
 0x747   :  { %979 = vst.msk [vmem:[#allocation2 + $0x8] sm:$0xf] %vm978_vm9, %v2235_v11 }
 0x748   :  { %980 = vst.msk [vmem:[#allocation2 + $0x14] sm:$0xf] %vm978_vm9, %v2235_v11  ;;  %vm989_vm9 = vcmask 1043712  }
 0x749   :  { %v848_v52 = vpop.permute.xlu0 %847 }
 0x74d   :  { %v2033_v41 = vld [vmem:[#allocation3 + $0xc] sm:$0xf0]  ;;  %v1930_v47 = vld [vmem:[#allocation3 + $0x10] sm:$0xf0] }
 0x74e   :  { %v1929_v8 = vor.u32 %v2033_v41, %v1928_v14  ;;  %v1933_v51 = vor.u32 %v2031_v44, %v1930_v47  ;;  %v2090_v14 = vpop.permute.xlu1 %2089 }
 0x750   :  { %924 = vmatpush.bf16.msra.mxu0 %v1929_v8  ;;  %937 = vmatpush.bf16.msra.mxu1 %v1933_v51 }
 0x751   :  { %v2700_v6 = vpop.permute.xlu2 %2109  ;;  %v2710_v16 = vpop.permute.xlu0 %2079 }
 0x752   :  { %v2082_v31 = vunpack.i.h.bf16 %v2710_v16  ;;  %v2081_v20 = vunpack.i.l.bf16 %v2710_v16  ;;  %v2112_v9 = vunpack.i.h.bf16 %v2700_v6  ;;  %v2111_v10 = vunpack.i.l.bf16 %v2700_v6 }
 0x753   :  { %1958 = vmatmul.msk.bf16.vlgmr.msra.gmra.mxu0 %vm900_vm14, %v833_v2  ;;  %1959 = vmatmul.msk.bf16.vlgmr.msra.gmra.mxu1 %vm900_vm14, %v833_v2  ;;  %vm990_vm14 = vcmask 1047556  }
 0x754   :  { %vm2702_vm15 = vmor %vm990_vm14, %vm989_vm9  ;;  %v1028_v1 = vsel %vm77_vm1, %v2081_v20, %v2082_v31  ;;  %v1360_v2 = vsel %vm485_vm4, %v2111_v10, %v2112_v9 }
 0x75f   :  { %v2120_v32 = vpop.permute.xlu2 %2119 }
 0x760   :  { %v2122_v48 = vunpack.i.h.bf16 %v2120_v32 }
 0x771   :  { %v2130_v13 = vpop.permute.xlu2 %2129 }
 0x772   :  { %v2132_v62 = vunpack.i.h.bf16 %v2130_v13  ;;  %v2131_v28 = vunpack.i.l.bf16 %v2130_v13 }
 0x774   :  { %v1572_v29 = vsel %vm746_vm7, %v2131_v28, %v2132_v62 }
 0x7c9   :  { %v952_v53 = vpop.f32.mrf.mxu2  ;;  %v965_v54 = vpop.f32.mrf.mxu3 }
 0x7ca   :  { %v953_v57 = vadd.f32 %v952_v53, %v848_v52  ;;  %v966_v58 = vadd.f32 %v965_v54, %v848_v52  ;;  %v2091_v53 = vunpack.i.l.bf16 %v2090_v14  ;;  %v2121_v54 = vunpack.i.l.bf16 %v2120_v32 }
 0x7cc   :  { %v971_v59 = vmax.f32 %v953_v57, 0.0  ;;  %v972_v49 = vmax.f32 %v966_v58, 0.0 }
 0x7ce   :  { %v2695_v60 = vpack.c.bf16 %v972_v49, %v971_v59  ;;  %v1452_v59 = vsel %vm599_vm5, %v2121_v54, %v2122_v48 }
 0x7d0   :  { %v926_v61 = vpop.f32.mrf.mxu0  ;;  %v939_v12 = vpop.f32.mrf.mxu1 }
 0x7d1   :  { %v927_v63 = vadd.f32 %v926_v61, %v848_v52  ;;  %v940_v3 = vadd.f32 %v939_v12, %v848_v52  ;;  %v954_v55 = vpop.f32.mrf.mxu2  ;;  %v967_v56 = vpop.f32.mrf.mxu3  ;;  %v2092_v52 = vunpack.i.h.bf16 %v2090_v14 }
 0x7d3   :  { %v969_v4 = vmax.f32 %v927_v63, 0.0  ;;  %v970_v5 = vmax.f32 %v940_v3, 0.0  ;;  %v1148_v58 = vsel %vm226_vm2, %v2091_v53, %v2092_v52 }
 0x7d5   :  { %v973_v39 = vpack.c.bf16 %v970_v5, %v969_v4 }
 0x7d7   :  { %982 = vrot.lane.b32.xlu2 %v973_v39, %s2236_s5 }
 0x7d8   :  { %v928_v11 = vpop.f32.mrf.mxu0  ;;  %v941_v42 = vpop.f32.mrf.mxu1 }
 0x831   :  { %v983_v25 = vpop.permute.xlu2 %982 }
 0x832   :  { %v984_v26 = vrot.slane %v983_v25, 4 }
 0x834   :  { %v986_v27 = vsel %vm985_vm10, %v984_v26, %v983_v25  ;;  %993 = vst.msk [vmem:[#allocation2 + $0x8] sm:$0xf] %vm975_vm13, %v984_v26  ;;  %v2760_v25 = vpop.permute.xlu0 %2084  ;;  %v2762_v26 = vpop.permute.xlu1 %2104 }
 0x835   :  { %992 = vst.msk [vmem:[#allocation2] sm:$0xff] %vm2702_vm15, %v986_v27 }
 0x83b   :  { %v1547_v19 = vld [vmem:[#allocation2 + $0x8] sm:$0xf] }
 0x83c   :  { %v1429_v21 = vld [vmem:[#allocation2 + $0x8] sm:$0xf]  ;;  %v1563_v36 = vunpack.c.l.bf16 %v1547_v19  ;;  %v2713_v35 = vld [vmem:[#allocation2] sm:$0xff]  ;;  %v2764_v27 = vpop.permute.xlu1 %2114 }
 0x83d   :  { %v1443_v37 = vunpack.c.l.bf16 %v1429_v21  ;;  %v1561_v34 = vunpack.c.l.bf16 %v2713_v35  ;;  %v1562_v7 = vunpack.c.h.bf16 %v2713_v35  ;;  %v1335_v3 = vld [vmem:[#allocation2 + $0x8] sm:$0xf] }
 0x83e   :  { %v1578_v17 = vmul.f32 %v2132_v62, %v1563_v36  ;;  %v1351_v4 = vunpack.c.l.bf16 %v1335_v3  ;;  %v1123_v5 = vld [vmem:[#allocation2 + $0x8] sm:$0xf]  ;;  %v2766_v62 = vpop.permute.xlu0 %2094 }
 0x83f   :  { %v1458_v18 = vmul.f32 %v2122_v48, %v1443_v37  ;;  %v1576_v46 = vmul.f32 %v2131_v28, %v1561_v34  ;;  %v1577_v23 = vmul.f32 %v1572_v29, %v1562_v7  ;;  %v2733_v30 = vmul.f32 %v2101_v15, %v1561_v34  ;;  %v1519_v39 = vld [vmem:[#allocation2 + $0x8] sm:$0xf] }
 0x840   :  { %v1580_v24 = vpack.c.bf16 %v1578_v17, %v1578_v17  ;;  %v2735_v33 = vmul.f32 %v1562_v7, %v1240_v38  ;;  %v2737_v40 = vmul.f32 %v2081_v20, %v1561_v34  ;;  %v1364_v41 = vmul.f32 %v2111_v10, %v1561_v34  ;;  %v1307_v32 = vld [vmem:[#allocation2 + $0x8] sm:$0xf] }
 0x841   :  { %v1460_v45 = vpack.c.bf16 %v1458_v18, %v1458_v18  ;;  %v1579_v0 = vpack.c.bf16 %v1577_v23, %v1576_v46  ;;  %v1365_v44 = vmul.f32 %v1562_v7, %v1360_v2  ;;  %v2739_v47 = vmul.f32 %v1562_v7, %v1028_v1 }
 0x842   :  { %1585 = vrot.lane.b32.xlu1 %v1580_v24, %s2234_s10  ;;  %v1247_v8 = vpack.c.bf16 %v2735_v33, %v2733_v30  ;;  %v1456_v49 = vmul.f32 %v2121_v54, %v1561_v34  ;;  %v1457_v61 = vmul.f32 %v1562_v7, %v1452_v59  ;;  %v1152_v12 = vmul.f32 %v2091_v53, %v1561_v34 }
 0x843   :  { %1465 = vrot.lane.b32.xlu2 %v1460_v45, %s2227_s14  ;;  %1583 = vrot.lane.b32.xlu0 %v1579_v0, %s2234_s10  ;;  %v1035_v51 = vpack.c.bf16 %v2739_v47, %v2737_v40  ;;  %v1367_v57 = vpack.c.bf16 %v1365_v44, %v1364_v41  ;;  %v1153_v63 = vmul.f32 %v1562_v7, %v1148_v58  ;;  %v1139_v42 = vunpack.c.l.bf16 %v1123_v5  ;;  %v1095_v40 = vld [vmem:[#allocation2 + $0x8] sm:$0xf] }
 0x844   :  { %v1459_v55 = vpack.c.bf16 %v1457_v61, %v1456_v49  ;;  %v2768_v28 = vpop.permute.xlu1 %2134  ;;  %v2086_v30 = vunpack.i.l.bf16 %v2760_v25  ;;  %v2096_v33 = vunpack.i.l.bf16 %v2766_v62 }
 0x845   :  { %v1155_v56 = vpack.c.bf16 %v1153_v63, %v1152_v12  ;;  %v1154_v6 = vmul.f32 %v2092_v52, %v1139_v42  ;;  %v2137_v54 = vunpack.i.h.bf16 %v2768_v28  ;;  %v2107_v42 = vunpack.i.h.bf16 %v2762_v26 }
 0x846   :  { %v2770_v19 = vpop.permute.xlu0 %2124 }
 0x847   :  { %v1156_v13 = vpack.c.bf16 %v1154_v6, %v1154_v6 }
 0x84a   :  { %995 = vrot.lane.b32.xlu1 %v2695_v60, %s2236_s5  ;;  %v1366_v60 = vmul.f32 %v2112_v9, %v1351_v4 }
 0x84b   :  { %1371 = vrot.lane.b32.xlu2 %v1367_v57, %s2226_s30  ;;  %1522 = vrot.lane.b32.xlu0 %v2713_v35, %s2228_s21 }
 0x84c   :  { %v1368_v11 = vpack.c.bf16 %v1366_v60, %v1366_v60 }
 0x852   :  { %1463 = vrot.lane.b32.xlu1 %v1459_v55, %s2227_s14 }
 0x853   :  { %1159 = vrot.lane.b32.xlu2 %v1155_v56, %s2230_s23  ;;  %1310 = vrot.lane.b32.xlu0 %v2713_v35, %s2225_s28 }
 0x85a   :  { %1524 = vrot.lane.b32.xlu1 %v1519_v39, %s2228_s21 }
 0x85b   :  { %1373 = vrot.lane.b32.xlu0 %v1368_v11, %s2226_s30 }
 0x862   :  { %1312 = vrot.lane.b32.xlu1 %v1307_v32, %s2225_s28  ;;  %v2127_v32 = vunpack.i.h.bf16 %v2770_v19 }
 0x863   :  { %1161 = vrot.lane.b32.xlu0 %v1156_v13, %s2230_s23 }
 0x89d   :  { %v1466_v24 = vpop.permute.xlu2 %1465 }
 0x89e   :  { %v1468_v38 = vrot.slane %v1466_v24, 4 }
 0x8a5   :  { %v1372_v58 = vpop.permute.xlu2 %1371 }
 0x8a6   :  { %v1375_v60 = vrot.slane %v1372_v58, 4 }
 0x8b4   :  { %v1586_v21 = vpop.permute.xlu1 %1585 }
 0x8b5   :  { %v1588_v48 = vrot.slane %v1586_v21, 4  ;;  %v1584_v36 = vpop.permute.xlu0 %1583 }
 0x8b6   :  { %v1587_v37 = vrot.slane %v1584_v36, 4 }
 0x8b8   :  { %v1589_v15 = vsel %vm72_vm0, %v1587_v37, %v1588_v48 }
 0x8b9   :  { %v1590_v34 = vsel %vm774_vm11, %v1584_v36, %v1589_v15 }
 0x8ba   :  { %v1709_v7 = vunpack.c.l.b16 %v1590_v34  ;;  %v1710_v20 = vunpack.c.h.b16 %v1590_v34  ;;  %v2136_v34 = vunpack.i.l.bf16 %v2768_v28  ;;  %v2117_v28 = vunpack.i.h.bf16 %v2764_v27 }
 0x8bc   :  { %v996_v29 = vpop.permute.xlu1 %995  ;;  %v1729_v17 = vpack.c.b16 %v1709_v7, %v1709_v7  ;;  %v1730_v18 = vpack.c.b16 %v1710_v20, %v1710_v20  ;;  %v1160_v7 = vpop.permute.xlu2 %1159 }
 0x8bd   :  { %v997_v9 = vrot.slane %v996_v29, 4  ;;  %v1523_v10 = vpop.permute.xlu0 %1522 }
 0x8be   :  { %v1754_v46 = vsel %vm72_vm0, %v1729_v17, 0  ;;  %v1757_v23 = vsel %vm72_vm0, %v1730_v18, 0  ;;  %v1526_v63 = vrot.slane %v1523_v10, 4 }
 0x8bf   :  { %v998_v45 = vsel %vm985_vm10, %v997_v9, %v996_v29  ;;  %1003 = vst.msk [vmem:[#allocation2 + $0x14] sm:$0xf] %vm975_vm13, %v997_v9  ;;  %1768 = vmatpush.bf16.msrb.mxu0 %v1754_v46  ;;  %1781 = vmatpush.bf16.msrb.mxu1 %v1757_v23  ;;  %vm2944_vm10 = vcmask 662528   ;;  %vm1749_vm13 = vcmask 588800  }
 0x8c0   :  { %1002 = vst.msk [vmem:[#allocation2 + $0xc] sm:$0xff] %vm2702_vm15, %v998_v45  ;;  %v1163_v45 = vrot.slane %v1160_v7, 4 }
 0x8c4   :  { %v1464_v0 = vpop.permute.xlu1 %1463 }
 0x8c5   :  { %v1467_v1 = vrot.slane %v1464_v0, 4  ;;  %v2780_v2 = vpop.permute.xlu0 %1310 }
 0x8c6   :  { %v1321_v14 = vld [vmem:[#allocation2 + $0x14] sm:$0xf]  ;;  %v1314_v9 = vrot.slane %v2780_v2, 4 }
 0x8c7   :  { %v1533_v41 = vld [vmem:[#allocation2 + $0x14] sm:$0xf]  ;;  %v1469_v44 = vsel %vm72_vm0, %v1467_v1, %v1468_v38  ;;  %1326 = vrot.lane.b32.xlu1 %v1321_v14, %s2225_s28  ;;  %v1320_v52 = vld [vmem:[#allocation2 + $0xc] sm:$0xff]  ;;  %v2087_v14 = vunpack.i.h.bf16 %v2760_v25 }
 0x8c8   :  { %1538 = vrot.lane.b32.xlu2 %v1533_v41, %s2228_s21  ;;  %v1594_v53 = vld [vmem:[#allocation2 + $0x14] sm:$0xf]  ;;  %v1470_v50 = vsel %vm2944_vm10, %v1464_v0, %v1469_v44  ;;  %1324 = vrot.lane.b32.xlu0 %v1320_v52, %s2225_s28  ;;  %v2800_v17 = vunpack.c.l.bf16 %v1320_v52  ;;  %v2802_v18 = vunpack.c.h.bf16 %v1320_v52  ;;  %v1619_v41 = vsel %vm746_vm7, %v2136_v34, %v2137_v54 }
 0x8c9   :  { %v1610_v57 = vunpack.c.l.bf16 %v1594_v53  ;;  %1472 = vst [vmem:[#allocation4 + $0x60] sm:$0xff] %v1470_v50  ;;  %v1262_v49 = vld [vmem:[#allocation2 + $0x14] sm:$0xf]  ;;  %vm2945_vm7 = vcmask 908288  }
 0x8ca   :  { %v1474_v61 = vld [vmem:[#allocation2 + $0x14] sm:$0xf]  ;;  %v1276_v4 = vunpack.c.l.bf16 %v1262_v49 }
 0x8cb   :  { %v1625_v59 = vmul.f32 %v2137_v54, %v1610_v57  ;;  %v1109_v39 = vld [vmem:[#allocation2 + $0x14] sm:$0xf]  ;;  %v1488_v11 = vunpack.c.l.bf16 %v1474_v61  ;;  %v1623_v61 = vmul.f32 %v2136_v34, %v2800_v17  ;;  %v1624_v54 = vmul.f32 %v1619_v41, %v2802_v18  ;;  %v1005_v41 = vld [vmem:[#allocation2 + $0x8] sm:$0xf] }
 0x8cc   :  { %v1525_v12 = vpop.permute.xlu1 %1524  ;;  %v1291_v36 = vmul.f32 %v2107_v42, %v1276_v4  ;;  %v1050_v15 = vld [vmem:[#allocation2 + $0x14] sm:$0xf] }
 0x8cd   :  { %v1527_v3 = vrot.slane %v1525_v12, 4  ;;  %v1374_v55 = vpop.permute.xlu0 %1373  ;;  %v1627_v56 = vpack.c.bf16 %v1625_v59, %v1625_v59  ;;  %v1503_v37 = vmul.f32 %v2127_v32, %v1488_v11  ;;  %v1382_v20 = vld [vmem:[#allocation2 + $0x14] sm:$0xf]  ;;  %v1064_v24 = vunpack.c.l.bf16 %v1050_v15 }
 0x8ce   :  { %v1376_v5 = vrot.slane %v1374_v55, 4  ;;  %v1293_v23 = vpack.c.bf16 %v1291_v36, %v1291_v36  ;;  %v1398_v1 = vunpack.c.l.bf16 %v1382_v20  ;;  %v1170_v55 = vld [vmem:[#allocation2 + $0x14] sm:$0xf]  ;;  %v1626_v4 = vpack.c.bf16 %v1624_v54, %v1623_v61 }
 0x8cf   :  { %v1528_v6 = vsel %vm72_vm0, %v1526_v63, %v1527_v3  ;;  %1114 = vrot.lane.b32.xlu1 %v1109_v39, %s2229_s22  ;;  %v1505_v38 = vpack.c.bf16 %v1503_v37, %v1503_v37  ;;  %v1079_v3 = vmul.f32 %v2087_v14, %v1064_v24  ;;  %v1186_v39 = vunpack.c.l.bf16 %v1170_v55 }
 0x8d0   :  { %1632 = vrot.lane.b32.xlu2 %v1627_v56, %s2234_s10  ;;  %v1529_v13 = vsel %vm699_vm12, %v1523_v10, %v1528_v6  ;;  %v1377_v21 = vsel %vm72_vm0, %v1375_v60, %v1376_v5  ;;  %1112 = vrot.lane.b32.xlu0 %v1320_v52, %s2229_s22  ;;  %v2012_v53 = vld [vmem:[#allocation4 + $0x60] sm:$0xf]  ;;  %v2051_v59 = vld [vmem:[#allocation4 + $0x64] sm:$0xf]  ;;  %v2126_v56 = vunpack.i.l.bf16 %v2770_v19  ;;  %v2097_v6 = vunpack.i.h.bf16 %v2766_v62 }
 0x8d1   :  { %1531 = vst [vmem:[#allocation4 + $0x70] sm:$0xff] %v1529_v13  ;;  %v1378_v48 = vsel %vm515_vm8, %v1372_v58, %v1377_v21  ;;  %v1081_v60 = vpack.c.bf16 %v1079_v3, %v1079_v3  ;;  %v2106_v20 = vunpack.i.l.bf16 %v2762_v26 }
 0x8d2   :  { %1380 = vst [vmem:[#allocation4 + $0x50] sm:$0xff] %v1378_v48  ;;  %v1497_v13 = vsel %vm599_vm5, %v2126_v56, %v2127_v32  ;;  %v1501_v15 = vmul.f32 %v2126_v56, %v2800_v17 }
 0x8d3   :  { %v1502_v34 = vmul.f32 %v2802_v18, %v1497_v13 }
 0x8d4   :  { %v1313_v29 = vpop.permute.xlu1 %1312 }
 0x8d5   :  { %v1315_v10 = vrot.slane %v1313_v29, 4  ;;  %v1162_v46 = vpop.permute.xlu0 %1161  ;;  %v2116_v29 = vunpack.i.l.bf16 %v2764_v27 }
 0x8d6   :  { %v1164_v0 = vrot.slane %v1162_v46, 4 }
 0x8d7   :  { %v1316_v44 = vsel %vm72_vm0, %v1314_v9, %v1315_v10  ;;  %1536 = vrot.lane.b32.xlu1 %v1320_v52, %s2228_s21  ;;  %v1504_v9 = vpack.c.bf16 %v1502_v34, %v1501_v15  ;;  %v1285_v10 = vsel %vm336_vm3, %v2106_v20, %v2107_v42  ;;  %v1407_v46 = vsel %vm485_vm4, %v2116_v29, %v2117_v28  ;;  %vm2949_vm4 = vmmov %vm2945_vm7 }
 0x8d8   :  { %1298 = vrot.lane.b32.xlu2 %v1293_v23, %s2233_s26  ;;  %v1317_v50 = vsel %vm439_vm6, %v2780_v2, %v1316_v44  ;;  %v1165_v57 = vsel %vm72_vm0, %v1163_v45, %v1164_v0  ;;  %1510 = vrot.lane.b32.xlu0 %v1505_v38, %s2227_s14  ;;  %v2053_v58 = vld [vmem:[#allocation4 + $0x6c] sm:$0xf0]  ;;  %v2014_v49 = vld [vmem:[#allocation4 + $0x70] sm:$0xf0]  ;;  %v1413_v2 = vmul.f32 %v2117_v28, %v1398_v1  ;;  %v1217_v44 = vld [vmem:[#allocation2 + $0x8] sm:$0xf] }
 0x8d9   :  { %1319 = vst [vmem:[#allocation4 + $0x40] sm:$0xff] %v1317_v50  ;;  %v1166_v52 = vsel %vm2945_vm7, %v1160_v7, %v1165_v57  ;;  %v2013_v12 = vor.u32 %v2053_v58, %v2012_v53  ;;  %v2017_v63 = vor.u32 %v2051_v59, %v2014_v49  ;;  %v2049_v11 = vld [vmem:[#allocation4 + $0x4c] sm:$0xf0]  ;;  %v1998_v36 = vld [vmem:[#allocation4 + $0x50] sm:$0xf0]  ;;  %v1201_v7 = vmul.f32 %v2097_v6, %v1186_v39 }
 0x8da   :  { %1168 = vst [vmem:[#allocation4 + $0x20] sm:$0xff] %v1166_v52  ;;  %v1415_v5 = vpack.c.bf16 %v1413_v2, %v1413_v2  ;;  %v1289_v23 = vmul.f32 %v2106_v20, %v2800_v17  ;;  %v1290_v27 = vmul.f32 %v2802_v18, %v1285_v10  ;;  %v1411_v24 = vmul.f32 %v2116_v29, %v2800_v17 }
 0x8db   :  { %1769 = vmatpush.bf16.msrb.mxu0 %v2013_v12  ;;  %1782 = vmatpush.bf16.msrb.mxu1 %v2017_v63  ;;  %v1203_v32 = vpack.c.bf16 %v1201_v7, %v1201_v7  ;;  %v1412_v45 = vmul.f32 %v2802_v18, %v1407_v46  ;;  %v1073_v42 = vsel %vm77_vm1, %v2086_v30, %v2087_v14  ;;  %v1019_v14 = vunpack.c.l.bf16 %v1005_v41 }
 0x8dc   :  { %v1195_v0 = vsel %vm226_vm2, %v2096_v33, %v2097_v6  ;;  %v1077_v38 = vmul.f32 %v2086_v30, %v2800_v17  ;;  %v1078_v62 = vmul.f32 %v2802_v18, %v1073_v42  ;;  %v1199_v1 = vmul.f32 %v2096_v33, %v2800_v17  ;;  %vm2947_vm2 = vmmov %vm2944_vm10 }
 0x8dd   :  { %v1414_v26 = vpack.c.bf16 %v1412_v45, %v1411_v24  ;;  %v1200_v28 = vmul.f32 %v2802_v18, %v1195_v0  ;;  %v1231_v50 = vunpack.c.l.bf16 %v1217_v44  ;;  %v1034_v47 = vmul.f32 %v2082_v31, %v1019_v14  ;;  %v1820_v24 = vld [vmem:[%s2934_s4] sm:$0xf] }
 0x8de   :  { %v1080_v25 = vpack.c.bf16 %v1078_v62, %v1077_v38  ;;  %vm2946_vm1 = vcmask 916480   ;;  %v1817_v14 = vld [vmem:[%s2930_s0] sm:$0x3f]  ;;  %vm2948_vm3 = vcmask 793600  }
 0x8df   :  { %1630 = vrot.lane.b32.xlu1 %v1626_v4, %s2234_s10  ;;  %v1202_v53 = vpack.c.bf16 %v1200_v28, %v1199_v1  ;;  %v1036_v17 = vpack.c.bf16 %v1034_v47, %v1034_v47  ;;  %v1819_v47 = vunpack.c.h.bf16 %v1817_v14  ;;  %vm2950_vm5 = vmmov %vm2948_vm3  ;;  %s1903_s10 = sshll.u32 %s2936_s6, 4  ;;  %s1904_s10 = int_to_ptr.hbm [resolvable:$true] %s1903_s10 }
 0x8e0   :  { %1086 = vrot.lane.b32.xlu2 %v1081_v60, %s2232_s25  ;;  %1420 = vrot.lane.b32.xlu0 %v1415_v5, %s2226_s30  ;;  %v1996_v21 = vld [vmem:[#allocation4 + $0x40] sm:$0xf]  ;;  %v2047_v48 = vld [vmem:[#allocation4 + $0x44] sm:$0xf] }
 0x8e1   :  { %v1997_v37 = vor.u32 %v2049_v11, %v1996_v21  ;;  %v2001_v19 = vor.u32 %v2047_v48, %v1998_v36  ;;  %1832 = vst [vmem:[#allocation1 + $0x10] ss:$2 sm:$0xff] %v1819_v47 }
 0x8e3   :  { %1770 = vmatpush.bf16.msrb.mxu0 %v1997_v37  ;;  %1783 = vmatpush.bf16.msrb.mxu1 %v2001_v19 }
 0x8e7   :  { %1251 = vrot.lane.b32.xlu1 %v1247_v8, %s2233_s26  ;;  %v1292_v8 = vpack.c.bf16 %v1290_v27, %v1289_v23 }
 0x8e8   :  { %1508 = vrot.lane.b32.xlu2 %v1504_v9, %s2227_s14  ;;  %1208 = vrot.lane.b32.xlu0 %v1203_v32, %s2230_s23 }
 0x8ef   :  { %1296 = vrot.lane.b32.xlu1 %v1292_v8, %s2233_s26 }
 0x8f0   :  { %1418 = vrot.lane.b32.xlu2 %v1414_v26, %s2226_s30  ;;  %1039 = vrot.lane.b32.xlu0 %v1035_v51, %s2232_s25  ;;  %v1246_v51 = vmul.f32 %v2102_v22, %v1231_v50 }
 0x8f2   :  { %v1248_v18 = vpack.c.bf16 %v1246_v51, %v1246_v51 }
 0x8f7   :  { %1084 = vrot.lane.b32.xlu1 %v1080_v25, %s2232_s25 }
 0x8f8   :  { %1206 = vrot.lane.b32.xlu2 %v1202_v53, %s2230_s23  ;;  %1100 = vrot.lane.b32.xlu0 %v1095_v40, %s2229_s22 }
 0x8ff   :  { %1041 = vrot.lane.b32.xlu1 %v1036_v17, %s2232_s25 }
 0x900   :  { %1253 = vrot.lane.b32.xlu2 %v1248_v18, %s2233_s26 }
 0x907   :  { %1823 = vperm.xlu1 %2138, %v1820_v24  }
 0x908   :  { %1098 = vrot.lane.b32.xlu2 %v2713_v35, %s2229_s22 }
 0x922   :  { %v1539_v57 = vpop.permute.xlu2 %1538 }
 0x923   :  { %v1541_v60 = vrot.slane %v1539_v57, 4  ;;  %v1818_v57 = vunpack.c.l.bf16 %v1817_v14 }
 0x925   :  { %1830 = vst [vmem:[#allocation1] ss:$2 sm:$0xff] %v1818_v57 }
 0x92a   :  { %v1633_v58 = vpop.permute.xlu2 %1632 }
 0x92b   :  { %v1635_v15 = vrot.slane %v1633_v58, 4 }
 0x932   :  { %v2871_v59 = vpop.permute.xlu2 %1298 }
 0x939   :  { %v1327_v49 = vpop.permute.xlu1 %1326 }
 0x93a   :  { %v2873_v61 = vpop.permute.xlu2 %1086  ;;  %v1329_v16 = vrot.slane %v1327_v49, 4  ;;  %v1325_v31 = vpop.permute.xlu0 %1324 }
 0x93b   :  { %v1328_v43 = vrot.slane %v1325_v31, 4 }
 0x93d   :  { %v1330_v22 = vsel %vm72_vm0, %v1328_v43, %v1329_v16 }
 0x93e   :  { %v1331_v54 = vsel %vm439_vm6, %v1325_v31, %v1330_v22 }
 0x93f   :  { %1333 = vst [vmem:[#allocation4 + $0x48] sm:$0xff] %v1331_v54 }
 0x941   :  { %v1115_v52 = vpop.permute.xlu1 %1114 }
 0x942   :  { %v1509_v12 = vpop.permute.xlu2 %1508  ;;  %v1117_v63 = vrot.slane %v1115_v52, 4  ;;  %v1113_v3 = vpop.permute.xlu0 %1112 }
 0x943   :  { %v1116_v35 = vrot.slane %v1113_v3, 4  ;;  %v1512_v11 = vrot.slane %v1509_v12, 4 }
 0x945   :  { %v1118_v2 = vsel %vm72_vm0, %v1116_v35, %v1117_v63  ;;  %v2030_v35 = vld [vmem:[%s2930_s0 + $0x6] sm:$0x3f]  ;;  %s2237_s0 = smov [#allocation10]  }
 0x946   :  { %v1119_v55 = vsel %vm2946_vm1, %v1113_v3, %v1118_v2  ;;  %v2004_v31 = vld [vmem:[#allocation4 + $0x48] sm:$0xf]  ;;  %v2048_v43 = vld [vmem:[#allocation4 + $0x4c] sm:$0xf]  ;;  %v1860_v2 = vld [vmem:[%s2934_s4] sm:$0xf] }
 0x947   :  { %1121 = vst [vmem:[#allocation4 + $0x18] sm:$0xff] %v1119_v55  ;;  %1863 = vperm.xlu2 %2139, %v1860_v2   ;;  %s1901_s4 = sshll.u32 %s2237_s0, 4  ;;  %s1902_s4 = int_to_ptr.vmem [resolvable:$true] %s1901_s4 }
 0x949   :  { %v1537_v56 = vpop.permute.xlu1 %1536 }
 0x94a   :  { %v1419_v4 = vpop.permute.xlu2 %1418  ;;  %v1540_v5 = vrot.slane %v1537_v56, 4  ;;  %v1511_v39 = vpop.permute.xlu0 %1510 }
 0x94b   :  { %v1513_v6 = vrot.slane %v1511_v39, 4  ;;  %v1422_v20 = vrot.slane %v1419_v4, 4  ;;  %v1859_v39 = vunpack.c.h.bf16 %v2030_v35 }
 0x94c   :  { %v1542_v13 = vsel %vm72_vm0, %v1540_v5, %v1541_v60 }
 0x94d   :  { %v1543_v21 = vsel %vm699_vm12, %v1537_v56, %v1542_v13  ;;  %v1514_v48 = vsel %vm72_vm0, %v1512_v11, %v1513_v6  ;;  %v1980_v56 = vld [vmem:[#allocation4 + $0x20] sm:$0xf]  ;;  %v1858_v13 = vunpack.c.l.bf16 %v2030_v35 }
 0x94e   :  { %1545 = vst [vmem:[#allocation4 + $0x78] sm:$0xff] %v1543_v21  ;;  %v1515_v36 = vsel %vm2947_vm2, %v1509_v12, %v1514_v48  ;;  %v1301_v12 = vrot.slane %v2871_v59, 4  ;;  %v2043_v59 = vld [vmem:[#allocation4 + $0x24] sm:$0xf] }
 0x94f   :  { %1517 = vst [vmem:[#allocation4 + $0x68] sm:$0xff] %v1515_v36  ;;  %v1835_v21 = vld.sshfl [vmem:[#allocation1 + $0x10] sm:$0xff pattern:$0x75316420] }
 0x950   :  { %v1834_v36 = vld.sshfl [vmem:[#allocation1 + $0x8] sm:$0xff pattern:$0x75316420]  ;;  %1840 = vrot.lane.b32.xlu1 %v1835_v21, %s2225_s28  ;;  %1872 = vst [vmem:[#allocation1 + $0x10] ss:$2 sm:$0xff] %v1859_v39 }
 0x951   :  { %v1631_v37 = vpop.permute.xlu1 %1630  ;;  %1838 = vrot.lane.b32.xlu0 %v1834_v36, %s2225_s28 }
 0x952   :  { %v1207_v19 = vpop.permute.xlu2 %1206  ;;  %v1634_v34 = vrot.slane %v1631_v37, 4  ;;  %v1421_v7 = vpop.permute.xlu0 %1420 }
 0x953   :  { %v1423_v29 = vrot.slane %v1421_v7, 4  ;;  %v1210_v25 = vrot.slane %v1207_v19, 4 }
 0x954   :  { %v1636_v9 = vsel %vm72_vm0, %v1634_v34, %v1635_v15  ;;  %v1089_v15 = vrot.slane %v2873_v61, 4 }
 0x955   :  { %v1637_v32 = vsel %vm774_vm11, %v1631_v37, %v1636_v9  ;;  %v1424_v10 = vsel %vm72_vm0, %v1422_v20, %v1423_v29  ;;  %v2054_v42 = vld [vmem:[#allocation4 + $0x74] sm:$0xf0]  ;;  %v2022_v0 = vld [vmem:[#allocation4 + $0x78] sm:$0xf0]  ;;  %vm2952_vm11 = vmmov %vm2946_vm1 }
 0x956   :  { %v1425_v46 = vsel %vm515_vm8, %v1419_v4, %v1424_v10  ;;  %v1711_v23 = vunpack.c.l.b16 %v1637_v32  ;;  %v1712_v27 = vunpack.c.h.b16 %v1637_v32  ;;  %v2020_v26 = vld [vmem:[#allocation4 + $0x68] sm:$0xf]  ;;  %v2052_v44 = vld [vmem:[#allocation4 + $0x6c] sm:$0xf]  ;;  %vm2951_vm8 = vcmask 924672  }
 0x957   :  { %1427 = vst [vmem:[#allocation4 + $0x58] sm:$0xff] %v1425_v46  ;;  %v2021_v40 = vor.u32 %v2054_v42, %v2020_v26  ;;  %v2025_v18 = vor.u32 %v2052_v44, %v2022_v0  ;;  %vm2953_vm12 = vmmov %vm2951_vm8  ;;  %v1974_v44 = vld [vmem:[#allocation4 + $0x18] sm:$0xf0] }
 0x958   :  { %v1731_v45 = vpack.c.b16 %v1711_v23, %v1711_v23  ;;  %v1732_v30 = vpack.c.b16 %v1712_v27, %v1712_v27 }
 0x959   :  { %v1252_v33 = vpop.permute.xlu1 %1251 }
 0x95a   :  { %v1254_v8 = vpop.permute.xlu2 %1253  ;;  %v1255_v38 = vrot.slane %v1252_v33, 4  ;;  %v1209_v1 = vpop.permute.xlu0 %1208  ;;  %v1760_v28 = vsel %vm72_vm0, %v1731_v45, 0  ;;  %v1763_v41 = vsel %vm72_vm0, %v1732_v30, 0 }
 0x95b   :  { %v1256_v62 = vrot.slane %v1254_v8, 4  ;;  %v1211_v53 = vrot.slane %v1209_v1, 4  ;;  %1794 = vmatpush.bf16.msrb.mxu2 %v1760_v28  ;;  %1807 = vmatpush.bf16.msrb.mxu3 %v1763_v41 }
 0x95d   :  { %v1257_v50 = vsel %vm72_vm0, %v1255_v38, %v1256_v62  ;;  %v1212_v17 = vsel %vm72_vm0, %v1210_v25, %v1211_v53  ;;  %v2042_v62 = vld [vmem:[#allocation4 + $0x14] sm:$0xf0] }
 0x95e   :  { %v1258_v51 = vsel %vm2948_vm3, %v1252_v33, %v1257_v50  ;;  %v1213_v58 = vsel %vm2949_vm4, %v1207_v19, %v1212_v17  ;;  %v2050_v49 = vld [vmem:[#allocation4 + $0x54] sm:$0xf0]  ;;  %v2006_v16 = vld [vmem:[#allocation4 + $0x58] sm:$0xf0]  ;;  %v1640_v50 = vld [vmem:[#allocation8] sm:$0x3] }
 0x95f   :  { %1260 = vst [vmem:[#allocation4 + $0x30] sm:$0xff] %v1258_v51  ;;  %1795 = vmatpush.bf16.msrb.mxu2 %v2021_v40  ;;  %1808 = vmatpush.bf16.msrb.mxu3 %v2025_v18  ;;  %v2005_v54 = vor.u32 %v2050_v49, %v2004_v31  ;;  %v2009_v52 = vor.u32 %v2048_v43, %v2006_v16  ;;  %v1833_v19 = vld.sshfl [vmem:[#allocation1] sm:$0xff pattern:$0x75316420] }
 0x960   :  { %1215 = vst [vmem:[#allocation4 + $0x28] sm:$0xff] %v1213_v58  ;;  %v1875_v33 = vld.sshfl [vmem:[#allocation1 + $0x10] sm:$0xff pattern:$0x75316420]  ;;  %1836 = vrot.lane.b32.xlu1 %v1833_v19, %s2225_s28 }
 0x961   :  { %v1297_v22 = vpop.permute.xlu1 %1296  ;;  %1870 = vst [vmem:[#allocation1] ss:$2 sm:$0xff] %v1858_v13  ;;  %1880 = vrot.lane.b32.xlu0 %v1875_v33, %s2225_s28 }
 0x962   :  { %v1300_v63 = vrot.slane %v1297_v22, 4  ;;  %v1040_v3 = vpop.permute.xlu0 %1039  ;;  %v1099_v48 = vpop.permute.xlu2 %1098 }
 0x963   :  { %1796 = vmatpush.bf16.msrb.mxu2 %v2005_v54  ;;  %1809 = vmatpush.bf16.msrb.mxu3 %v2009_v52  ;;  %v1102_v20 = vrot.slane %v1099_v48, 4  ;;  %v1043_v42 = vrot.slane %v1040_v3, 4 }
 0x964   :  { %v1302_v55 = vsel %vm72_vm0, %v1300_v63, %v1301_v12 }
 0x965   :  { %v1303_v4 = vsel %vm2950_vm5, %v1297_v22, %v1302_v55 }
 0x966   :  { %v2045_v60 = vld [vmem:[#allocation4 + $0x2c] sm:$0xf0]  ;;  %v1982_v5 = vld [vmem:[#allocation4 + $0x30] sm:$0xf0]  ;;  %1305 = vst [vmem:[#allocation4 + $0x38] sm:$0xff] %v1303_v4 }
 0x967   :  { %v1981_v11 = vor.u32 %v2045_v60, %v1980_v56  ;;  %v1985_v6 = vor.u32 %v2043_v59, %v1982_v5  ;;  %v1988_v32 = vld [vmem:[#allocation4 + $0x28] sm:$0xf]  ;;  %v2044_v27 = vld [vmem:[#allocation4 + $0x2c] sm:$0xf] }
 0x968   :  { %v1874_v26 = vld.sshfl [vmem:[#allocation1 + $0x8] sm:$0xff pattern:$0x75316420]  ;;  %v1873_v14 = vld.sshfl [vmem:[#allocation1] sm:$0xff pattern:$0x75316420] }
 0x969   :  { %1771 = vmatpush.bf16.msrb.mxu0 %v1981_v11  ;;  %1784 = vmatpush.bf16.msrb.mxu1 %v1985_v6  ;;  %v1085_v37 = vpop.permute.xlu1 %1084 }
 0x96a   :  { %v1088_v34 = vrot.slane %v1085_v37, 4  ;;  %v1101_v7 = vpop.permute.xlu0 %1100  ;;  %1878 = vrot.lane.b32.xlu2 %v1874_v26, %s2225_s28 }
 0x96b   :  { %v1103_v29 = vrot.slane %v1101_v7, 4 }
 0x96c   :  { %v1090_v9 = vsel %vm72_vm0, %v1088_v34, %v1089_v15 }
 0x96d   :  { %v1091_v10 = vsel %vm2951_vm8, %v1085_v37, %v1090_v9  ;;  %v1104_v46 = vsel %vm72_vm0, %v1102_v20, %v1103_v29  ;;  %v2046_v23 = vld [vmem:[#allocation4 + $0x34] sm:$0xf0]  ;;  %v1990_v24 = vld [vmem:[#allocation4 + $0x38] sm:$0xf0] }
 0x96e   :  { %1093 = vst [vmem:[#allocation4 + $0x8] sm:$0xff] %v1091_v10  ;;  %v1105_v45 = vsel %vm2952_vm11, %v1099_v48, %v1104_v46  ;;  %v1989_v30 = vor.u32 %v2046_v23, %v1988_v32  ;;  %v1993_v61 = vor.u32 %v2044_v27, %v1990_v24 }
 0x96f   :  { %1107 = vst [vmem:[#allocation4 + $0x10] sm:$0xff] %v1105_v45 }
 0x970   :  { %1797 = vmatpush.bf16.msrb.mxu2 %v1989_v30  ;;  %1810 = vmatpush.bf16.msrb.mxu3 %v1993_v61 }
 0x971   :  { %v1042_v8 = vpop.permute.xlu1 %1041 }
 0x972   :  { %v1044_v0 = vrot.slane %v1042_v8, 4  ;;  %1876 = vrot.lane.b32.xlu2 %v1873_v14, %s2225_s28 }
 0x974   :  { %v1045_v38 = vsel %vm72_vm0, %v1043_v42, %v1044_v0 }
 0x975   :  { %v1046_v1 = vsel %vm2953_vm12, %v1040_v3, %v1045_v38  ;;  %v1972_v28 = vld [vmem:[#allocation4 + $0x8] sm:$0xf]  ;;  %v2040_v41 = vld [vmem:[#allocation4 + $0xc] sm:$0xf] }
 0x976   :  { %1048 = vst [vmem:[#allocation4] sm:$0xff] %v1046_v1  ;;  %v1973_v25 = vor.u32 %v2042_v62, %v1972_v28  ;;  %v1977_v53 = vor.u32 %v2040_v41, %v1974_v44  ;;  %v2041_v40 = vld [vmem:[#allocation4 + $0xc] sm:$0xf0]  ;;  %v1966_v17 = vld [vmem:[#allocation4 + $0x10] sm:$0xf0] }
 0x978   :  { %1798 = vmatpush.bf16.msrb.mxu2 %v1973_v25  ;;  %1811 = vmatpush.bf16.msrb.mxu3 %v1977_v53 }
 0x979   :  { %v1824_v49 = vpop.permute.xlu1 %1823 }
 0x97b   :  { %2028 = vmatmul.msk.bf16.vlgmr.msrb.gmra.mxu2 %vm1749_vm13, %v1640_v50  ;;  %2029 = vmatmul.msk.bf16.vlgmr.msrb.gmra.mxu3 %vm1749_vm13, %v1640_v50 }
 0x97d   :  { %v1964_v47 = vld [vmem:[#allocation4] sm:$0xf]  ;;  %v2039_v51 = vld [vmem:[#allocation4 + $0x4] sm:$0xf] }
 0x97e   :  { %v1965_v18 = vor.u32 %v2041_v40, %v1964_v47  ;;  %v1969_v57 = vor.u32 %v2039_v51, %v1966_v17 }
 0x980   :  { %1772 = vmatpush.bf16.msrb.mxu0 %v1965_v18  ;;  %1785 = vmatpush.bf16.msrb.mxu1 %v1969_v57 }
 0x983   :  { %2026 = vmatmul.msk.bf16.vlgmr.msrb.gmra.mxu0 %vm1749_vm13, %v1640_v50  ;;  %2027 = vmatmul.msk.bf16.vlgmr.msrb.gmra.mxu1 %vm1749_vm13, %v1640_v50 }
 0x9a1   :  { %v1864_v58 = vpop.permute.xlu2 %1863 }
 0x9c2   :  { %v1841_v43 = vpop.permute.xlu1 %1840 }
 0x9c3   :  { %v1839_v16 = vpop.permute.xlu0 %1838 }
 0x9c4   :  { %v1879_v31 = vpop.permute.xlu2 %1878  ;;  %v1844_v11 = vsel %vm439_vm6, %v1839_v16, %v1841_v43 }
 0x9cc   :  { %v1877_v54 = vpop.permute.xlu2 %1876 }
 0x9cd   :  { %v1882_v55 = vsel %vm439_vm6, %v1877_v54, %v1879_v31 }
 0x9d2   :  { %v1837_v63 = vpop.permute.xlu1 %1836 }
 0x9d3   :  { %v1881_v22 = vpop.permute.xlu0 %1880  ;;  %v1843_v6 = vsel %vm439_vm6, %v1837_v63, %v1839_v16 }
 0x9d4   :  { %v1883_v2 = vsel %vm439_vm6, %v1879_v31, %v1881_v22 }
 0x9fe   :  { %v1800_v52 = vpop.f32.mrf.mxu2  ;;  %v1813_v12 = vpop.f32.mrf.mxu3 }
 0x9ff   :  { %v1866_v3 = vadd.f32 %v1864_v58, %v1800_v52  ;;  %v1867_v35 = vadd.f32 %v1864_v58, %v1813_v12 }
 0xa00   :  { %v1774_v56 = vpop.f32.mrf.mxu0  ;;  %v1787_v4 = vpop.f32.mrf.mxu1 }
 0xa01   :  { %v1886_v60 = vadd.f32 %v1882_v55, %v1866_v3  ;;  %v1887_v59 = vadd.f32 %v1883_v2, %v1867_v35  ;;  %v1826_v5 = vadd.f32 %v1824_v49, %v1774_v56  ;;  %v1827_v39 = vadd.f32 %v1824_v49, %v1787_v4 }
 0xa03   :  { %v1889_v13 = vmax.f32 %v1887_v59, 0.0  ;;  %v1847_v21 = vadd.f32 %v1843_v6, %v1826_v5  ;;  %v1848_v48 = vadd.f32 %v1844_v11, %v1827_v39  ;;  %v1888_v36 = vmax.f32 %v1886_v60, 0.0 }
 0xa05   :  { %v1892_v37 = vrot.slane %v1889_v13, 4  ;;  %v1850_v19 = vmax.f32 %v1848_v48, 0.0  ;;  %v1849_v20 = vmax.f32 %v1847_v21, 0.0 }
 0xa06   :  { %v1802_v15 = vpop.f32.mrf.mxu2  ;;  %v1815_v34 = vpop.f32.mrf.mxu3 }
 0xa07   :  { %v1893_v7 = vsel %vm72_vm0, %v1888_v36, %v1892_v37  ;;  %v1853_v29 = vrot.slane %v1850_v19, 4 }
 0xa08   :  { %1896 = vst [vmem:[#allocation10 + $0x8] sm:$0xff] %v1893_v7  ;;  %v1776_v9 = vpop.f32.mrf.mxu0  ;;  %v1789_v32 = vpop.f32.mrf.mxu1 }
 0xa09   :  { %v1854_v10 = vsel %vm72_vm0, %v1849_v20, %v1853_v29 }
 0xa0a   :  { %1856 = vst [vmem:[#allocation10] sm:$0xff] %v1854_v10 }
 0xa0b   :  { %1909 = dma.vmem_to_hbm [thread:$0]  %s1902_s4, 256, %s1904_s10, [#allocation7], %s2238_s12, %s2238_s12, %s2239_s13  }
 0xa0c   :  { %2216 = dma.done.wait [#allocation7], 256  }
 0xa0d   :  { %2217 = vsyncadd [#allocation7], 4294967040 }
 0xa0e   :  { %1914 = vsyncpa [#allocation6], 1 }
 0xa0f   :  { %1915 = vsyncpa [#allocation9], 1 }
 0xa10   :  { %1916 = vsyncpa [#allocation7], 1 }

</bundles_post_ra>
